<compile_context>
chip_gen: v7x
topology: tpu7x:2x2x1
jax: 0.10.0
libtpu: 0.0.40
codegen_flags: <defaults>
</compile_context>

<pallas_src>
import jax
import jax.numpy as jnp
from jax.experimental import pallas as pl
from jax.experimental.pallas import tpu as pltpu


# ----------------------------------------------------------------------------
# Hardware probes (trace-time, host-side; all failures fall back safely)
# ----------------------------------------------------------------------------
def _vmem_capacity_bytes():
    try:
        info = pltpu.get_tpu_info()
        for name in ("vmem_capacity_bytes", "vmem_size_bytes", "vmem_bytes"):
            v = getattr(info, name, None)
            if v:
                return int(v)
    except Exception:
        pass
    return 64 * 1024 * 1024  # conservative: v7x per-core VMEM


def _vmem_budget_bytes():
    # Working-set budget per core.  Never assume more than ~48 MiB even on
    # 128 MiB parts (diminishing returns past a few MiB per block), and stay
    # well under v7x's 64 MiB/core physical VMEM.
    return min(int(_vmem_capacity_bytes() * 0.6), 48 * 1024 * 1024)


def _num_tensorcores():
    """TensorCores per JAX device.  v5e / v6e (and v2/v3, one core per device)
    get 1; v4/v5p megacore and v7x get 2."""
    try:
        kind = jax.devices()[0].device_kind.lower()
    except Exception:
        return 1
    if ("lite" in kind or "v5e" in kind or "v6e" in kind
            or "v2" in kind or "v3" in kind):
        return 1
    return 2


# ----------------------------------------------------------------------------
# Tiling choice
# ----------------------------------------------------------------------------
_ACC_BUDGET = 2 * 1024 * 1024   # total f32 bytes for the 5 narrow accumulators
_MAX_UNROLL = 8                 # static chunk-loop unroll per grid step


def _round_up(x, m):
    return -(-x // m) * m


def _pick_tiling(length, rows, itemsize, tile_lanes=None):
    """Returns (acc_w, tile, num_tiles).

    acc_w: accumulator lane width (multiple of 128, fixed across steps).
    tile : input block lane width = n_chunks * acc_w.
    num_tiles: grid steps along the (padded) lane axis.
    """
    plen0 = _round_up(length, 128)

    # Narrow accumulator width from a fixed budget (5 f32 accumulators).
    acc_w = (_ACC_BUDGET // (5 * rows * 4)) // 128 * 128
    acc_w = int(max(128, min(acc_w, plen0)))

    if tile_lanes is not None and tile_lanes >= 128 and tile_lanes % 128 == 0:
        # Respect an explicitly requested lane-tile (test / tuning hook).
        acc_w = min(acc_w, tile_lanes)
        while tile_lanes % acc_w != 0:
            acc_w -= 128
        cpt = tile_lanes // acc_w
    else:
        budget = _vmem_budget_bytes()
        acc_bytes = 5 * rows * acc_w * 4
        per_chunk = 2 * 2 * rows * acc_w * itemsize      # 2 inputs x 2 buffers
        cap = max(1, int((budget - acc_bytes - (2 << 20)) // per_chunk))
        target = max(1, int((4 << 20) // (rows * acc_w * itemsize)))  # ~4 MiB
        cpt = max(1, min(cap, target, _MAX_UNROLL))

    nchunks = _round_up(plen0, acc_w) // acc_w
    cpt = min(cpt, nchunks)
    num_tiles = -(-nchunks // cpt)

    # Avoid a degenerate single giant step: keep >= 4 pipeline steps when a
    # block is big enough (> ~1 MiB) that DMA/compute overlap matters.
    if num_tiles < 4 <= nchunks and rows * cpt * acc_w * itemsize > (1 << 20):
        num_tiles = 4
        cpt = -(-nchunks // num_tiles)
        num_tiles = -(-nchunks // cpt)

    tile = cpt * acc_w
    return acc_w, tile, num_tiles


# ----------------------------------------------------------------------------
# Pallas kernel: fused IOU + BCE (+ val-range min/max) partial reductions
# ----------------------------------------------------------------------------
def _make_kernel(n_chunks, acc_w):
    def kernel(p_ref, t_ref,
               inter_ref, pt_ref, bce_ref, mx_ref, mn_ref,
               acc_i, acc_pt, acc_b, acc_mx, acc_mn):
        step = pl.program_id(1)

        @pl.when(step == 0)
        def _init():
            acc_i[...] = jnp.zeros_like(acc_i)
            acc_pt[...] = jnp.zeros_like(acc_pt)
            acc_b[...] = jnp.zeros_like(acc_b)
            acc_mx[...] = jnp.full_like(acc_mx, -jnp.inf)
            acc_mn[...] = jnp.full_like(acc_mn, jnp.inf)

        # Static unrolled chunk loop: acc_w-wide STATIC slices of the input
        # tile (no reshape -> no layout-crossing VMEM copies).
        for c in range(n_chunks):
            sl = slice(c * acc_w, (c + 1) * acc_w)
            p = p_ref[:, sl].astype(jnp.float32)
            t = t_ref[:, sl].astype(jnp.float32)

            # IOU partials: sum(p*t) and sum(p)+sum(t) fused (IOU only ever
            # uses their sum via Ior).
            acc_i[...] += p * t
            acc_pt[...] += p + t

            # BCE partials, trimmed form: -(t*log p + (1-t)*log q)
            #   == -(log q + t*(log p - log q)); negate once at finalize.
            # Logs clamped at -100 (torch BCELoss) BEFORE the multiply.
            log_p = jnp.maximum(jnp.log(p), -100.0)
            log_q = jnp.maximum(jnp.log(1.0 - p), -100.0)
            acc_b[...] += log_q + t * (log_p - log_q)

            # MS-SSIM level-0 val-range scan (max/min of prediction) fused in.
            acc_mx[...] = jnp.maximum(acc_mx[...], p)
            acc_mn[...] = jnp.minimum(acc_mn[...], p)

        @pl.when(step == pl.num_programs(1) - 1)
        def _finalize():
            inter_ref[...] = jnp.sum(acc_i[...], axis=1, keepdims=True)
            pt_ref[...] = jnp.sum(acc_pt[...], axis=1, keepdims=True)
            bce_ref[...] = -jnp.sum(acc_b[...], axis=1, keepdims=True)
            mx_ref[...] = jnp.max(acc_mx[...], axis=1, keepdims=True)
            mn_ref[...] = jnp.min(acc_mn[...], axis=1, keepdims=True)

    return kernel


def _iou_bce_stats(prediction, target, tile_lanes=None):
    """Per-(n,c) sums of p*t and p+t, total BCE sum, and min/max of p."""
    N, C, H, W = prediction.shape
    rows = N * C
    length = H * W
    itemsize = max(jnp.dtype(prediction.dtype).itemsize,
                   jnp.dtype(target.dtype).itemsize)

    acc_w, tile, num_tiles = _pick_tiling(length, rows, itemsize, tile_lanes)
    n_chunks = tile // acc_w

    # Split the reduction axis across the 2 TensorCores only on chips that
    # actually have 2 (v7x / megacore); on v5e/v6e it would just be a serial
    # outer loop with doubled output rows.
    nsplit = 1
    if _num_tensorcores() >= 2 and rows % 8 == 0 and num_tiles >= 2:
        nsplit = 2
        num_tiles = _round_up(num_tiles, 2)
    tiles_per_core = num_tiles // nsplit
    plen = num_tiles * tile

    # Contiguous (N*C, H*W) views — no transpose.  Zero-pad the lane axis when
    # needed; exact: p=t=0 contributes 0 to every partial sum (after the -100
    # clamp) and cannot move the val-range thresholds (0 in [-0.5, 128]).
    p2 = prediction.reshape(rows, length)
    t2 = target.reshape(rows, length)
    if plen > length:
        pad = ((0, 0), (0, plen - length))
        p2 = jnp.pad(p2, pad)
        t2 = jnp.pad(t2, pad)

    in_spec = pl.BlockSpec((rows, tile),
                           lambda c, i, _t=tiles_per_core: (0, c * _t + i))
    out_spec = pl.BlockSpec((rows, 1), lambda c, i: (c, 0))
    out_sds = jax.ShapeDtypeStruct((nsplit * rows, 1), jnp.float32)

    needed = (2 * 2 * rows * tile * itemsize          # inputs, double-buffered
              + 5 * rows * acc_w * 4                  # narrow accumulators
              + 5 * 8 * 128 * 4 * 2)                  # tiny outputs
    vmem_limit = int(min(max(needed + (16 << 20), 32 << 20), 56 << 20))

    inter_r, pt_r, bce_r, mx_r, mn_r = pl.pallas_call(
        _make_kernel(n_chunks, acc_w),
        out_shape=(out_sds,) * 5,
        grid_spec=pltpu.PrefetchScalarGridSpec(
            num_scalar_prefetch=0,
            grid=(nsplit, tiles_per_core),
            in_specs=[in_spec, in_spec],
            out_specs=(out_spec,) * 5,
            scratch_shapes=[pltpu.VMEM((rows, acc_w), jnp.float32)
                            for _ in range(5)],
        ),
        compiler_params=pltpu.CompilerParams(
            # TODO(synk): if xprof shows one v7x core doing all tiles, switch
            # the leading axis to pltpu.CORE_PARALLEL.
            dimension_semantics=("parallel", "arbitrary"),
            vmem_limit_bytes=vmem_limit),
    )(p2, t2)

    # Tiny wrapper-side combine: fold the core-split axis and the channel axis.
    inter = inter_r.reshape(nsplit, N, C).sum(axis=(0, 2))   # (N,)
    ptsum = pt_r.reshape(nsplit, N, C).sum(axis=(0, 2))      # (N,)
    bce_sum = jnp.sum(bce_r)                                  # scalar
    pmax = jnp.max(mx_r)
    pmin = jnp.min(mn_r)
    return inter, ptsum, bce_sum, pmax, pmin


# ----------------------------------------------------------------------------
# MS-SSIM term (XLA; separable Gaussian + stacked depthwise convs)
# ----------------------------------------------------------------------------
_MSSSIM_WEIGHTS = (0.0448, 0.2856, 0.3001, 0.2363, 0.1333)


def _gaussian_1d(window_size, sigma=1.5):
    x = jnp.arange(window_size, dtype=jnp.float32)
    g = jnp.exp(-((x - window_size // 2) ** 2) / (2.0 * sigma ** 2))
    return g / jnp.sum(g)


def _sep_depthwise_blur(x, g1d):
    """Separable depthwise Gaussian blur (two 1-D passes, VALID padding).
    Mathematically identical to convolving with outer(g, g)."""
    k = g1d.shape[0]
    c = x.shape[1]
    kh = jnp.broadcast_to(g1d.reshape(1, 1, k, 1), (c, 1, k, 1))
    kw = jnp.broadcast_to(g1d.reshape(1, 1, 1, k), (c, 1, 1, k))
    y = jax.lax.conv_general_dilated(
        x, kh, (1, 1), "VALID",
        dimension_numbers=("NCHW", "OIHW", "NCHW"), feature_group_count=c)
    y = jax.lax.conv_general_dilated(
        y, kw, (1, 1), "VALID",
        dimension_numbers=("NCHW", "OIHW", "NCHW"), feature_group_count=c)
    return y


def _ssim(img1, img2, window_size, max1=None, min1=None):
    # val_range=None branch of the reference implementation.
    if max1 is None:
        max1 = jnp.max(img1)
    if min1 is None:
        min1 = jnp.min(img1)
    max_val = jnp.where(max1 > 128.0, 255.0, 1.0)
    min_val = jnp.where(min1 < -0.5, -1.0, 0.0)
    L = max_val - min_val

    _, channel, height, width = img1.shape
    real_size = min(window_size, height, width)
    g1d = _gaussian_1d(real_size, 1.5)

    # One grouped separable blur over the five stacked operands instead of six
    # separate 11x11 depthwise convs.
    stacked = jnp.concatenate(
        [img1, img2, img1 * img1, img2 * img2, img1 * img2], axis=1)
    blurred = _sep_depthwise_blur(stacked, g1d)
    mu1, mu2, e11, e22, e12 = jnp.split(blurred, 5, axis=1)

    mu1_sq = mu1 * mu1
    mu2_sq = mu2 * mu2
    mu1_mu2 = mu1 * mu2
    sigma1_sq = e11 - mu1_sq
    sigma2_sq = e22 - mu2_sq
    sigma12 = e12 - mu1_mu2

    C1 = (0.01 * L) ** 2
    C2 = (0.03 * L) ** 2
    v1 = 2.0 * sigma12 + C2
    v2 = sigma1_sq + sigma2_sq + C2
    cs = jnp.mean(v1 / v2)
    ssim_map = (2.0 * mu1_mu2 + C1) * v1 / ((mu1_sq + mu2_sq + C1) * v2)
    return jnp.mean(ssim_map), cs


def _avg_pool_2x2(x):
    return jax.lax.reduce_window(
        x, 0.0, jax.lax.add, (1, 1, 2, 2), (1, 1, 2, 2), "VALID") * 0.25


def _msssim(img1, img2, window_size=11, normalize=True, max0=None, min0=None):
    weights = jnp.asarray(_MSSSIM_WEIGHTS, dtype=jnp.float32)
    levels = len(_MSSSIM_WEIGHTS)
    mssim, mcs = [], []
    for lvl in range(levels):
        if lvl == 0:
            sim, cs = _ssim(img1, img2, window_size, max1=max0, min1=min0)
        else:
            sim, cs = _ssim(img1, img2, window_size)
        mssim.append(sim)
        mcs.append(cs)
        if lvl < levels - 1:   # pooled result after the last level is unused
            img1 = _avg_pool_2x2(img1)
            img2 = _avg_pool_2x2(img2)
    mssim = jnp.stack(mssim)
    mcs = jnp.stack(mcs)
    if normalize:
        mssim = (mssim + 1.0) / 2.0
        mcs = (mcs + 1.0) / 2.0
    pow1 = mcs ** weights
    pow2 = mssim ** weights
    # Exactly reproduces the reference: torch.prod(pow1[:-1] * pow2[-1]).
    return jnp.prod(pow1[:-1] * pow2[-1])


# ----------------------------------------------------------------------------
# unet_3Loss forward
# ----------------------------------------------------------------------------
def unet_3_loss(prediction, target, tile_lanes=None):
    """prediction/target: (N, C, H, W) probability / 0-1 tensors."""
    N, C, H, W = prediction.shape
    inter, ptsum, bce_sum, pmax, pmin = _iou_bce_stats(
        prediction, target, tile_lanes=tile_lanes)

    # IOU loss: mean over batch of (1 - Iand / Ior), Ior = sum(p)+sum(t)-Iand.
    ior = ptsum - inter
    iou_loss = jnp.mean(1.0 - inter / ior)

    # BCE loss: mean over all (true, un-padded) elements.
    bce_loss = bce_sum / float(N * C * H * W)

    # MS-SSIM loss (normalize=True in the module); level-0 val-range scan is
    # taken from the fused kernel outputs.
    msssim_loss = 1.0 - _msssim(prediction.astype(jnp.float32),
                                target.astype(jnp.float32),
                                window_size=11, normalize=True,
                                max0=pmax, min0=pmin)

    return iou_loss + bce_loss + msssim_loss


# ----------------------------------------------------------------------------
# Pure-JAX reference for the Pallas-backed terms
# ----------------------------------------------------------------------------
def _reference(prediction, target):
    p = prediction.astype(jnp.float32)
    t = target.astype(jnp.float32)
    inter = jnp.sum(p * t, axis=(1, 2, 3))
    ior = jnp.sum(t, axis=(1, 2, 3)) + jnp.sum(p, axis=(1, 2, 3)) - inter
    iou_loss = jnp.mean(1.0 - inter / ior)
    log_p = jnp.maximum(jnp.log(p), -100.0)
    log_q = jnp.maximum(jnp.log(1.0 - p), -100.0)
    bce_loss = jnp.mean(-(t * log_p + (1.0 - t) * log_q))
    msssim_loss = 1.0 - _msssim(p, t, window_size=11, normalize=True)
    return iou_loss + bce_loss + msssim_loss


if __name__ == "__main__":
    key = jax.random.PRNGKey(0)
    k1, k2 = jax.random.split(key)
    # 5-level MS-SSIM (11x11 window + four 2x2 avg-pools) requires H, W >= 32;
    # use a small UNet-style shape.
    N, C, H, W = 2, 4, 64, 64
    prediction = jax.nn.sigmoid(jax.random.normal(k1, (N, C, H, W), jnp.float32))
    target = (jax.random.uniform(k2, (N, C, H, W)) > 0.5).astype(jnp.float32)

    # Default (auto tile size) path.
    loss_auto = jax.block_until_ready(jax.jit(unet_3_loss)(prediction, target))
    # Forced multi-tile path: exercises grid accumulation (+ dual-core split
    # on chips that have two TensorCores).
    loss_tiled = jax.block_until_ready(
        jax.jit(lambda p, t: unet_3_loss(p, t, tile_lanes=512))(prediction, target))

    ref = jax.block_until_ready(jax.jit(_reference)(prediction, target))

    assert bool(jnp.isfinite(loss_auto)), loss_auto
    assert jnp.allclose(loss_auto, ref, rtol=1e-5, atol=1e-5), (loss_auto, ref)
    assert jnp.allclose(loss_tiled, ref, rtol=1e-5, atol=1e-5), (loss_tiled, ref)
    print("KERNEL_OK")
</pallas_src>

<mosaic_0001>
module attributes {stable_mosaic.version = 11 : i64} {
  func.func @kernel(%arg0: i32, %arg1: i32, %arg2: memref<8x4096xf32, #tpu.memory_space<vmem>>, %arg3: memref<8x4096xf32, #tpu.memory_space<vmem>>, %arg4: memref<8x1xf32, #tpu.memory_space<vmem>>, %arg5: memref<8x1xf32, #tpu.memory_space<vmem>>, %arg6: memref<8x1xf32, #tpu.memory_space<vmem>>, %arg7: memref<8x1xf32, #tpu.memory_space<vmem>>, %arg8: memref<8x1xf32, #tpu.memory_space<vmem>>, %arg9: memref<8x4096xf32, #tpu.memory_space<vmem>>, %arg10: memref<8x4096xf32, #tpu.memory_space<vmem>>, %arg11: memref<8x4096xf32, #tpu.memory_space<vmem>>, %arg12: memref<8x4096xf32, #tpu.memory_space<vmem>>, %arg13: memref<8x4096xf32, #tpu.memory_space<vmem>>) attributes {dimension_semantics = [#tpu.dimension_semantics<parallel>, #tpu.dimension_semantics<arbitrary>], iteration_bounds = array<i64: 1, 1>, scalar_prefetch = 0 : i64, scratch_operands = 5 : i64, tpu.core_type = #tpu.core_type<tc>, window_params = [{transform_indices = @transform_0, window_bounds = array<i64: 8, 4096>}, {transform_indices = @transform_1, window_bounds = array<i64: 8, 4096>}, {transform_indices = @transform_2, window_bounds = array<i64: 8, 1>}, {transform_indices = @transform_3, window_bounds = array<i64: 8, 1>}, {transform_indices = @transform_4, window_bounds = array<i64: 8, 1>}, {transform_indices = @transform_5, window_bounds = array<i64: 8, 1>}, {transform_indices = @transform_6, window_bounds = array<i64: 8, 1>}]} {
    %c0_i32 = arith.constant 0 : i32
    %0 = arith.cmpi eq, %arg1, %c0_i32 : i32
    %1 = arith.extui %0 : i1 to i32
    %c0_i32_0 = arith.constant 0 : i32
    %2 = arith.cmpi ne, %1, %c0_i32_0 : i32
    scf.if %2 {
      %cst_28 = arith.constant 0.000000e+00 : f32
      %36 = vector.broadcast %cst_28 : f32 to vector<8x4096xf32>
      %c0_29 = arith.constant 0 : index
      %c0_30 = arith.constant 0 : index
      %37 = vector.load %arg9[%c0_29, %c0_30] : memref<8x4096xf32, #tpu.memory_space<vmem>>, vector<8x4096xf32>
      tpu.vector_store %arg9[%c0_29, %c0_30], %36 {strides = array<i32>} : memref<8x4096xf32, #tpu.memory_space<vmem>>, vector<8x4096xf32>,
      %cst_31 = arith.constant 0.000000e+00 : f32
      %38 = vector.broadcast %cst_31 : f32 to vector<8x4096xf32>
      %c0_32 = arith.constant 0 : index
      %c0_33 = arith.constant 0 : index
      %39 = vector.load %arg10[%c0_32, %c0_33] : memref<8x4096xf32, #tpu.memory_space<vmem>>, vector<8x4096xf32>
      tpu.vector_store %arg10[%c0_32, %c0_33], %38 {strides = array<i32>} : memref<8x4096xf32, #tpu.memory_space<vmem>>, vector<8x4096xf32>,
      %cst_34 = arith.constant 0.000000e+00 : f32
      %40 = vector.broadcast %cst_34 : f32 to vector<8x4096xf32>
      %c0_35 = arith.constant 0 : index
      %c0_36 = arith.constant 0 : index
      %41 = vector.load %arg11[%c0_35, %c0_36] : memref<8x4096xf32, #tpu.memory_space<vmem>>, vector<8x4096xf32>
      tpu.vector_store %arg11[%c0_35, %c0_36], %40 {strides = array<i32>} : memref<8x4096xf32, #tpu.memory_space<vmem>>, vector<8x4096xf32>,
      %cst_37 = arith.constant 0xFF800000 : f32
      %42 = vector.broadcast %cst_37 : f32 to vector<8x4096xf32>
      %c0_38 = arith.constant 0 : index
      %c0_39 = arith.constant 0 : index
      %43 = vector.load %arg12[%c0_38, %c0_39] : memref<8x4096xf32, #tpu.memory_space<vmem>>, vector<8x4096xf32>
      tpu.vector_store %arg12[%c0_38, %c0_39], %42 {strides = array<i32>} : memref<8x4096xf32, #tpu.memory_space<vmem>>, vector<8x4096xf32>,
      %cst_40 = arith.constant 0x7F800000 : f32
      %44 = vector.broadcast %cst_40 : f32 to vector<8x4096xf32>
      %c0_41 = arith.constant 0 : index
      %c0_42 = arith.constant 0 : index
      %45 = vector.load %arg13[%c0_41, %c0_42] : memref<8x4096xf32, #tpu.memory_space<vmem>>, vector<8x4096xf32>
      tpu.vector_store %arg13[%c0_41, %c0_42], %44 {strides = array<i32>} : memref<8x4096xf32, #tpu.memory_space<vmem>>, vector<8x4096xf32>,
    } else {
    }
    %c0 = arith.constant 0 : index
    %c0_1 = arith.constant 0 : index
    %3 = vector.load %arg2[%c0, %c0_1] : memref<8x4096xf32, #tpu.memory_space<vmem>>, vector<8x4096xf32>
    %c0_2 = arith.constant 0 : index
    %c0_3 = arith.constant 0 : index
    %4 = vector.load %arg3[%c0_2, %c0_3] : memref<8x4096xf32, #tpu.memory_space<vmem>>, vector<8x4096xf32>
    %c0_4 = arith.constant 0 : index
    %c0_5 = arith.constant 0 : index
    %5 = vector.load %arg9[%c0_4, %c0_5] : memref<8x4096xf32, #tpu.memory_space<vmem>>, vector<8x4096xf32>
    %6 = arith.mulf %3, %4 : vector<8x4096xf32>
    %7 = arith.addf %5, %6 : vector<8x4096xf32>
    %c0_6 = arith.constant 0 : index
    %c0_7 = arith.constant 0 : index
    %8 = vector.load %arg9[%c0_6, %c0_7] : memref<8x4096xf32, #tpu.memory_space<vmem>>, vector<8x4096xf32>
    tpu.vector_store %arg9[%c0_6, %c0_7], %7 {strides = array<i32>} : memref<8x4096xf32, #tpu.memory_space<vmem>>, vector<8x4096xf32>,
    %c0_8 = arith.constant 0 : index
    %c0_9 = arith.constant 0 : index
    %9 = vector.load %arg10[%c0_8, %c0_9] : memref<8x4096xf32, #tpu.memory_space<vmem>>, vector<8x4096xf32>
    %10 = arith.addf %3, %4 : vector<8x4096xf32>
    %11 = arith.addf %9, %10 : vector<8x4096xf32>
    %c0_10 = arith.constant 0 : index
    %c0_11 = arith.constant 0 : index
    %12 = vector.load %arg10[%c0_10, %c0_11] : memref<8x4096xf32, #tpu.memory_space<vmem>>, vector<8x4096xf32>
    tpu.vector_store %arg10[%c0_10, %c0_11], %11 {strides = array<i32>} : memref<8x4096xf32, #tpu.memory_space<vmem>>, vector<8x4096xf32>,
    %13 = math.log %3 : vector<8x4096xf32>
    %cst = arith.constant -1.000000e+02 : f32
    %14 = vector.broadcast %cst : f32 to vector<8x4096xf32>
    %15 = arith.maximumf %13, %14 : vector<8x4096xf32>
    %cst_12 = arith.constant 1.000000e+00 : f32
    %16 = vector.broadcast %cst_12 : f32 to vector<8x4096xf32>
    %17 = arith.subf %16, %3 : vector<8x4096xf32>
    %18 = math.log %17 : vector<8x4096xf32>
    %cst_13 = arith.constant -1.000000e+02 : f32
    %19 = vector.broadcast %cst_13 : f32 to vector<8x4096xf32>
    %20 = arith.maximumf %18, %19 : vector<8x4096xf32>
    %c0_14 = arith.constant 0 : index
    %c0_15 = arith.constant 0 : index
    %21 = vector.load %arg11[%c0_14, %c0_15] : memref<8x4096xf32, #tpu.memory_space<vmem>>, vector<8x4096xf32>
    %22 = arith.subf %15, %20 : vector<8x4096xf32>
    %23 = arith.mulf %4, %22 : vector<8x4096xf32>
    %24 = arith.addf %20, %23 : vector<8x4096xf32>
    %25 = arith.addf %21, %24 : vector<8x4096xf32>
    %c0_16 = arith.constant 0 : index
    %c0_17 = arith.constant 0 : index
    %26 = vector.load %arg11[%c0_16, %c0_17] : memref<8x4096xf32, #tpu.memory_space<vmem>>, vector<8x4096xf32>
    tpu.vector_store %arg11[%c0_16, %c0_17], %25 {strides = array<i32>} : memref<8x4096xf32, #tpu.memory_space<vmem>>, vector<8x4096xf32>,
    %c0_18 = arith.constant 0 : index
    %c0_19 = arith.constant 0 : index
    %27 = vector.load %arg12[%c0_18, %c0_19] : memref<8x4096xf32, #tpu.memory_space<vmem>>, vector<8x4096xf32>
    %28 = arith.maximumf %27, %3 : vector<8x4096xf32>
    %c0_20 = arith.constant 0 : index
    %c0_21 = arith.constant 0 : index
    %29 = vector.load %arg12[%c0_20, %c0_21] : memref<8x4096xf32, #tpu.memory_space<vmem>>, vector<8x4096xf32>
    tpu.vector_store %arg12[%c0_20, %c0_21], %28 {strides = array<i32>} : memref<8x4096xf32, #tpu.memory_space<vmem>>, vector<8x4096xf32>,
    %c0_22 = arith.constant 0 : index
    %c0_23 = arith.constant 0 : index
    %30 = vector.load %arg13[%c0_22, %c0_23] : memref<8x4096xf32, #tpu.memory_space<vmem>>, vector<8x4096xf32>
    %31 = arith.minimumf %30, %3 : vector<8x4096xf32>
    %c0_24 = arith.constant 0 : index
    %c0_25 = arith.constant 0 : index
    %32 = vector.load %arg13[%c0_24, %c0_25] : memref<8x4096xf32, #tpu.memory_space<vmem>>, vector<8x4096xf32>
    tpu.vector_store %arg13[%c0_24, %c0_25], %31 {strides = array<i32>} : memref<8x4096xf32, #tpu.memory_space<vmem>>, vector<8x4096xf32>,
    %c0_i32_26 = arith.constant 0 : i32
    %33 = arith.cmpi eq, %arg1, %c0_i32_26 : i32
    %34 = arith.extui %33 : i1 to i32
    %c0_i32_27 = arith.constant 0 : i32
    %35 = arith.cmpi ne, %34, %c0_i32_27 : i32
    scf.if %35 {
      %c0_28 = arith.constant 0 : index
      %c0_29 = arith.constant 0 : index
      %36 = vector.load %arg9[%c0_28, %c0_29] : memref<8x4096xf32, #tpu.memory_space<vmem>>, vector<8x4096xf32>
      %cst_30 = arith.constant dense<0.000000e+00> : vector<8xf32>
      %37 = vector.multi_reduction <add>, %36, %cst_30 [1] : vector<8x4096xf32> to vector<8xf32>
      %38 = vector.shape_cast %37 : vector<8xf32> to vector<8x1xf32>
      %c0_31 = arith.constant 0 : index
      %c0_32 = arith.constant 0 : index
      %39 = vector.load %arg4[%c0_31, %c0_32] : memref<8x1xf32, #tpu.memory_space<vmem>>, vector<8x1xf32>
      tpu.vector_store %arg4[%c0_31, %c0_32], %38 {strides = array<i32>} : memref<8x1xf32, #tpu.memory_space<vmem>>, vector<8x1xf32>,
      %c0_33 = arith.constant 0 : index
      %c0_34 = arith.constant 0 : index
      %40 = vector.load %arg10[%c0_33, %c0_34] : memref<8x4096xf32, #tpu.memory_space<vmem>>, vector<8x4096xf32>
      %cst_35 = arith.constant dense<0.000000e+00> : vector<8xf32>
      %41 = vector.multi_reduction <add>, %40, %cst_35 [1] : vector<8x4096xf32> to vector<8xf32>
      %42 = vector.shape_cast %41 : vector<8xf32> to vector<8x1xf32>
      %c0_36 = arith.constant 0 : index
      %c0_37 = arith.constant 0 : index
      %43 = vector.load %arg5[%c0_36, %c0_37] : memref<8x1xf32, #tpu.memory_space<vmem>>, vector<8x1xf32>
      tpu.vector_store %arg5[%c0_36, %c0_37], %42 {strides = array<i32>} : memref<8x1xf32, #tpu.memory_space<vmem>>, vector<8x1xf32>,
      %c0_38 = arith.constant 0 : index
      %c0_39 = arith.constant 0 : index
      %44 = vector.load %arg11[%c0_38, %c0_39] : memref<8x4096xf32, #tpu.memory_space<vmem>>, vector<8x4096xf32>
      %cst_40 = arith.constant dense<0.000000e+00> : vector<8xf32>
      %45 = vector.multi_reduction <add>, %44, %cst_40 [1] : vector<8x4096xf32> to vector<8xf32>
      %46 = vector.shape_cast %45 : vector<8xf32> to vector<8x1xf32>
      %cst_41 = arith.constant 0.000000e+00 : f32
      %47 = vector.broadcast %cst_41 : f32 to vector<8x1xf32>
      %48 = arith.subf %47, %46 : vector<8x1xf32>
      %c0_42 = arith.constant 0 : index
      %c0_43 = arith.constant 0 : index
      %49 = vector.load %arg6[%c0_42, %c0_43] : memref<8x1xf32, #tpu.memory_space<vmem>>, vector<8x1xf32>
      tpu.vector_store %arg6[%c0_42, %c0_43], %48 {strides = array<i32>} : memref<8x1xf32, #tpu.memory_space<vmem>>, vector<8x1xf32>,
      %c0_44 = arith.constant 0 : index
      %c0_45 = arith.constant 0 : index
      %50 = vector.load %arg12[%c0_44, %c0_45] : memref<8x4096xf32, #tpu.memory_space<vmem>>, vector<8x4096xf32>
      %cst_46 = arith.constant dense<0xFF800000> : vector<8xf32>
      %51 = vector.multi_reduction <maximumf>, %50, %cst_46 [1] : vector<8x4096xf32> to vector<8xf32>
      %52 = vector.shape_cast %51 : vector<8xf32> to vector<8x1xf32>
      %c0_47 = arith.constant 0 : index
      %c0_48 = arith.constant 0 : index
      %53 = vector.load %arg7[%c0_47, %c0_48] : memref<8x1xf32, #tpu.memory_space<vmem>>, vector<8x1xf32>
      tpu.vector_store %arg7[%c0_47, %c0_48], %52 {strides = array<i32>} : memref<8x1xf32, #tpu.memory_space<vmem>>, vector<8x1xf32>,
      %c0_49 = arith.constant 0 : index
      %c0_50 = arith.constant 0 : index
      %54 = vector.load %arg13[%c0_49, %c0_50] : memref<8x4096xf32, #tpu.memory_space<vmem>>, vector<8x4096xf32>
      %cst_51 = arith.constant dense<0x7F800000> : vector<8xf32>
      %55 = vector.multi_reduction <minimumf>, %54, %cst_51 [1] : vector<8x4096xf32> to vector<8xf32>
      %56 = vector.shape_cast %55 : vector<8xf32> to vector<8x1xf32>
      %c0_52 = arith.constant 0 : index
      %c0_53 = arith.constant 0 : index
      %57 = vector.load %arg8[%c0_52, %c0_53] : memref<8x1xf32, #tpu.memory_space<vmem>>, vector<8x1xf32>
      tpu.vector_store %arg8[%c0_52, %c0_53], %56 {strides = array<i32>} : memref<8x1xf32, #tpu.memory_space<vmem>>, vector<8x1xf32>,
    } else {
    }
    return
  }
  func.func @transform_0(%arg0: i32, %arg1: i32) -> (i32, i32) {
    %c1_i32 = arith.constant 1 : i32
    %0 = arith.muli %arg0, %c1_i32 : i32
    %1 = arith.addi %0, %arg1 : i32
    %c0_i32 = arith.constant 0 : i32
    %c0_i32_0 = arith.constant 0 : i32
    return %c0_i32, %1 : i32, i32
  }
  func.func @transform_1(%arg0: i32, %arg1: i32) -> (i32, i32) {
    %c1_i32 = arith.constant 1 : i32
    %0 = arith.muli %arg0, %c1_i32 : i32
    %1 = arith.addi %0, %arg1 : i32
    %c0_i32 = arith.constant 0 : i32
    %c0_i32_0 = arith.constant 0 : i32
    return %c0_i32, %1 : i32, i32
  }
  func.func @transform_2(%arg0: i32, %arg1: i32) -> (i32, i32) {
    %c0_i32 = arith.constant 0 : i32
    %c0_i32_0 = arith.constant 0 : i32
    return %arg0, %c0_i32 : i32, i32
  }
  func.func @transform_3(%arg0: i32, %arg1: i32) -> (i32, i32) {
    %c0_i32 = arith.constant 0 : i32
    %c0_i32_0 = arith.constant 0 : i32
    return %arg0, %c0_i32 : i32, i32
  }
  func.func @transform_4(%arg0: i32, %arg1: i32) -> (i32, i32) {
    %c0_i32 = arith.constant 0 : i32
    %c0_i32_0 = arith.constant 0 : i32
    return %arg0, %c0_i32 : i32, i32
  }
  func.func @transform_5(%arg0: i32, %arg1: i32) -> (i32, i32) {
    %c0_i32 = arith.constant 0 : i32
    %c0_i32_0 = arith.constant 0 : i32
    return %arg0, %c0_i32 : i32, i32
  }
  func.func @transform_6(%arg0: i32, %arg1: i32) -> (i32, i32) {
    %c0_i32 = arith.constant 0 : i32
    %c0_i32_0 = arith.constant 0 : i32
    return %arg0, %c0_i32 : i32, i32
  }
}

</mosaic_0001>

<bundles_post_ra>
// kernel: unet_3_loss.1
= control target key start
LH: loop header
LB: loop body
LE: loop exit
PB: predicated region body
PF: predicated region fallthrough
CT: control target
= control target key end

     0   :  { %vm1220_vm0 = vcmask 7168   ;;  %s2663_s0 = inlined_call_operand.vmem [shape: f32[8,4096], index: 0, kind: input, shape index: {}]   ;;  %s2664_s1 = inlined_call_operand.vmem [shape: f32[8,4096], index: 1, kind: input, shape index: {}]   ;;  %s2665_s2 = inlined_call_operand.vmem [shape: f32[8,1], index: 2, kind: output, shape index: {0}]   ;;  %s2666_s3 = inlined_call_operand.vmem [shape: f32[8,1], index: 3, kind: output, shape index: {1}]   ;;  %s2667_s5 = inlined_call_operand.vmem [shape: f32[8,1], index: 5, kind: output, shape index: {3}]   ;;  %s2668_s4 = inlined_call_operand.vmem [shape: f32[8,1], index: 4, kind: output, shape index: {2}]   ;;  %s2669_s6 = inlined_call_operand.vmem [shape: f32[8,1], index: 6, kind: output, shape index: {4}]  }
   0x1   :  { %v1693_v0 = vld [vmem:[%s2663_s0 + $0x40] sm:$0xff]  ;;  %v1698_v1 = vld [vmem:[%s2663_s0 + $0x48] sm:$0xff]  ;;  %v1705_v3 = vld [vmem:[%s2663_s0 + $0x50] sm:$0xff] }
   0x2   :  { %v1457_v2 = vmin.f32 %v1698_v1, %v1693_v0  ;;  %v1711_v5 = vld [vmem:[%s2663_s0 + $0x58] sm:$0xff]  ;;  %v1717_v7 = vld [vmem:[%s2663_s0 + $0x60] sm:$0xff]  ;;  %v1723_v9 = vld [vmem:[%s2663_s0 + $0x68] sm:$0xff]  ;;  %v1391_v13 = vmax.f32 %v1698_v1, %v1693_v0 }
   0x3   :  { %v1729_v11 = vld [vmem:[%s2663_s0 + $0x70] sm:$0xff]  ;;  %v1737_v14 = vld [vmem:[%s2663_s0 + $0x78] sm:$0xff]  ;;  %v1742_v15 = vld [vmem:[%s2664_s1] sm:$0xff] }
   0x4   :  { %v1458_v4 = vmin.f32 %v1705_v3, %v1457_v2  ;;  %v1747_v16 = vld [vmem:[%s2664_s1 + $0x8] sm:$0xff]  ;;  %v1752_v17 = vld [vmem:[%s2663_s0] sm:$0xff]  ;;  %v1768_v21 = vld [vmem:[%s2664_s1 + $0x10] sm:$0xff]  ;;  %v1392_v26 = vmax.f32 %v1705_v3, %v1391_v13 }
   0x5   :  { %v1758_v19 = vld [vmem:[%s2663_s0 + $0x8] sm:$0xff]  ;;  %v1763_v20 = vld [vmem:[%s2663_s0 + $0x80] sm:$0xff]  ;;  %2709 = vst [vmem:[#allocation7_spill] sm:$0xff] %v1768_v21  ;;  %v320_v23 = vmul.f32 %v1742_v15, %v1752_v17  ;;  %v1778_v25 = vld [vmem:[%s2663_s0 + $0x10] sm:$0xff]  ;;  %1519 = vlog2.f32 %v1752_v17 }
   0x6   :  { %v1459_v6 = vmin.f32 %v1711_v5, %v1458_v4  ;;  %v321_v24 = vmul.f32 %v1747_v16, %v1758_v19  ;;  %v1784_v27 = vld [vmem:[%s2663_s0 + $0x88] sm:$0xff]  ;;  %v1789_v28 = vld [vmem:[%s2664_s1 + $0x18] sm:$0xff]  ;;  %v322_v30 = vmul.f32 %v1768_v21, %v1778_v25  ;;  %v1802_v32 = vld [vmem:[%s2663_s0 + $0x90] sm:$0xff]  ;;  %v1393_v38 = vmax.f32 %v1711_v5, %v1392_v26 }
   0x7   :  { %2710 = vst [vmem:[#allocation8_spill] sm:$0xff] %v1789_v28  ;;  %v1797_v31 = vld [vmem:[%s2663_s0 + $0x18] sm:$0xff]  ;;  %v1807_v33 = vld [vmem:[%s2664_s1 + $0x20] sm:$0xff]  ;;  %v1826_v40 = vld [vmem:[%s2664_s1 + $0x28] sm:$0xff]  ;;  %1521 = vlog2.f32 %v1758_v19 }
   0x8   :  { %v1460_v8 = vmin.f32 %v1717_v7, %v1459_v6  ;;  %2711 = vst [vmem:[#allocation9_spill] sm:$0xff] %v1797_v31  ;;  %2712 = vst [vmem:[#allocation10_spill] sm:$0xff] %v1807_v33  ;;  %v323_v35 = vmul.f32 %v1789_v28, %v1797_v31  ;;  %v1187_v36 = vadd.f32 %v321_v24, %v320_v23  ;;  %v1815_v37 = vld [vmem:[%s2663_s0 + $0x20] sm:$0xff]  ;;  %v1821_v39 = vld [vmem:[%s2663_s0 + $0x98] sm:$0xff]  ;;  %1523 = vlog2.f32 %v1778_v25 }
   0x9   :  { %2713 = vst [vmem:[#allocation11_spill] sm:$0xff] %v1826_v40  ;;  %v324_v42 = vmul.f32 %v1807_v33, %v1815_v37  ;;  %v1834_v44 = vld [vmem:[%s2663_s0 + $0x28] sm:$0xff]  ;;  %v1839_v45 = vld [vmem:[%s2663_s0 + $0xa0] sm:$0xff]  ;;  %v1844_v46 = vld [vmem:[%s2664_s1 + $0x30] sm:$0xff]  ;;  %v1394_v51 = vmax.f32 %v1717_v7, %v1393_v38  ;;  %v448_v6 = vadd.f32 %v1742_v15, %v1752_v17  ;;  %v450_v23 = vadd.f32 %v1768_v21, %v1778_v25 }
   0xa   :  { %v1461_v10 = vmin.f32 %v1723_v9, %v1460_v8  ;;  %v1188_v43 = vadd.f32 %v1187_v36, %v322_v30  ;;  %2714 = vst [vmem:[#allocation12_spill] sm:$0xff] %v1839_v45  ;;  %2715 = vst [vmem:[#allocation13_spill] sm:$0xff] %v1844_v46  ;;  %v325_v48 = vmul.f32 %v1826_v40, %v1834_v44  ;;  %v1852_v50 = vld [vmem:[%s2663_s0 + $0x30] sm:$0xff]  ;;  %v1858_v52 = vld [vmem:[%s2663_s0 + $0xa8] sm:$0xff]  ;;  %1525 = vlog2.f32 %v1797_v31 }
   0xb   :  { %2716 = vst [vmem:[#allocation14_spill] sm:$0xff] %v1858_v52  ;;  %v1863_v53 = vld [vmem:[%s2664_s1 + $0x38] sm:$0xff]  ;;  %v326_v55 = vmul.f32 %v1844_v46, %v1852_v50  ;;  %v1876_v58 = vld [vmem:[%s2663_s0 + $0xb0] sm:$0xff]  ;;  %v1881_v59 = vld [vmem:[%s2664_s1 + $0x40] sm:$0xff]  ;;  %v1395_v63 = vmax.f32 %v1723_v9, %v1394_v51  ;;  %v449_v8 = vadd.f32 %v1747_v16, %v1758_v19  ;;  %v451_v36 = vadd.f32 %v1789_v28, %v1797_v31 }
   0xc   :  { %v1462_v12 = vmin.f32 %v1729_v11, %v1461_v10  ;;  %v1189_v49 = vadd.f32 %v1188_v43, %v323_v35  ;;  %2717 = vst [vmem:[#allocation15_spill] sm:$0xff] %v1863_v53  ;;  %v1871_v57 = vld [vmem:[%s2663_s0 + $0x38] sm:$0xff]  ;;  %2718 = vst [vmem:[#allocation16_spill] sm:$0xff] %v1876_v58  ;;  %v1895_v4 = vld [vmem:[%s2664_s1 + $0x48] sm:$0xff]  ;;  %1527 = vlog2.f32 %v1815_v37 }
   0xd   :  { %2719 = vst [vmem:[#allocation17_spill] sm:$0xff] %v1881_v59  ;;  %v327_v61 = vmul.f32 %v1863_v53, %v1871_v57  ;;  %v1890_v2 = vld [vmem:[%s2663_s0 + $0xb8] sm:$0xff]  ;;  %2721 = vst [vmem:[#allocation19_spill] sm:$0xff] %v1895_v4  ;;  %v329_v26 = vmul.f32 %v1895_v4, %v1698_v1  ;;  %v1396_v30 = vmax.f32 %v1729_v11, %v1395_v63  ;;  %1529 = vlog2.f32 %v1834_v44 }
   0xe   :  { %v1463_v18 = vmin.f32 %v1737_v14, %v1462_v12  ;;  %v1190_v56 = vadd.f32 %v1189_v49, %v324_v42  ;;  %2720 = vst [vmem:[#allocation18_spill] sm:$0xff] %v1890_v2  ;;  %v328_v12 = vmul.f32 %v1881_v59, %v1693_v0  ;;  %v1928_v35 = vld [vmem:[%s2664_s1 + $0x58] sm:$0xff]  ;;  %v1254_v38 = vadd.f32 %v449_v8, %v448_v6 }
   0xf   :  { %2723 = vst [vmem:[#allocation21_spill] sm:$0xff] %v1928_v35  ;;  %v452_v49 = vadd.f32 %v1807_v33, %v1815_v37  ;;  %v453_v63 = vadd.f32 %v1826_v40, %v1834_v44  ;;  %1531 = vlog2.f32 %v1852_v50 }
  0x10   :  { %v1464_v22 = vmin.f32 %v1763_v20, %v1463_v18  ;;  %v1191_v62 = vadd.f32 %v1190_v56, %v325_v48  ;;  %v1907_v18 = vld [vmem:[%s2663_s0 + $0xc0] sm:$0xff]  ;;  %v1255_v51 = vadd.f32 %v1254_v38, %v450_v23  ;;  %v1974_v23 = vld [vmem:[%s2664_s1 + $0x70] sm:$0xff]  ;;  %1533 = vlog2.f32 %v1871_v57 }
  0x11   :  { %v1943_v48 = vld [vmem:[%s2664_s1 + $0x60] sm:$0xff]  ;;  %2728 = vst [vmem:[#allocation26_spill] sm:$0xff] %v1974_v23  ;;  %1535 = vlog2.f32 %v1693_v0 }
  0x12   :  { %v1465_v29 = vmin.f32 %v1784_v27, %v1464_v22  ;;  %v1192_v13 = vadd.f32 %v1191_v62, %v326_v55  ;;  %v1912_v22 = vld [vmem:[%s2664_s1 + $0x50] sm:$0xff]  ;;  %2725 = vst [vmem:[#allocation23_spill] sm:$0xff] %v1943_v48  ;;  %v331_v55 = vmul.f32 %v1928_v35, %v1711_v5  ;;  %v1959_v62 = vld [vmem:[%s2664_s1 + $0x68] sm:$0xff]  ;;  %v1256_v6 = vadd.f32 %v1255_v51, %v451_v36 }
  0x13   :  { %2722 = vst [vmem:[#allocation20_spill] sm:$0xff] %v1912_v22  ;;  %v330_v42 = vmul.f32 %v1912_v22, %v1705_v3  ;;  %2727 = vst [vmem:[#allocation25_spill] sm:$0xff] %v1959_v62  ;;  %1537 = vlog2.f32 %v1698_v1 }
  0x14   :  { %v1466_v34 = vmin.f32 %v1802_v32, %v1465_v29  ;;  %v1193_v29 = vadd.f32 %v1192_v13, %v327_v61  ;;  %v1954_v61 = vld [vmem:[%s2663_s0 + $0xd8] sm:$0xff]  ;;  %v1969_v13 = vld [vmem:[%s2663_s0 + $0xe0] sm:$0xff]  ;;  %1539 = vlog2.f32 %v1705_v3 }
  0x15   :  { %2726 = vst [vmem:[#allocation24_spill] sm:$0xff] %v1954_v61  ;;  %1541 = vlog2.f32 %v1711_v5 }
  0x16   :  { %v1467_v41 = vmin.f32 %v1821_v39, %v1466_v34  ;;  %v1923_v34 = vld [vmem:[%s2663_s0 + $0xc8] sm:$0xff]  ;;  %v1194_v43 = vadd.f32 %v1193_v29, %v328_v12  ;;  %1543 = vlog2.f32 %v1717_v7 }
  0x17   :  { %1545 = vlog2.f32 %v1723_v9 }
  0x18   :  { %v1468_v47 = vmin.f32 %v1839_v45, %v1467_v41  ;;  %v1195_v56 = vadd.f32 %v1194_v43, %v329_v26  ;;  %v1257_v26 = vadd.f32 %v1256_v6, %v452_v49  ;;  %v455_v43 = vadd.f32 %v1863_v53, %v1871_v57 }
  0x19   :  { %v456_v6 = vadd.f32 %v1881_v59, %v1693_v0  ;;  %v458_v59 = vadd.f32 %v1912_v22, %v1705_v3  ;;  %1547 = vlog2.f32 %v1729_v11 }
  0x1a   :  { %v1469_v54 = vmin.f32 %v1858_v52, %v1468_v47  ;;  %v1938_v47 = vld [vmem:[%s2663_s0 + $0xd0] sm:$0xff]  ;;  %v1196_v12 = vadd.f32 %v1195_v56, %v330_v42  ;;  %v1990_v42 = vld [vmem:[%s2664_s1 + $0x78] sm:$0xff]  ;;  %v1258_v49 = vadd.f32 %v1257_v26, %v453_v63  ;;  %1549 = vlog2.f32 %v1737_v14 }
  0x1b   :  { %2724 = vst [vmem:[#allocation22_spill] sm:$0xff] %v1938_v47  ;;  %2729 = vst [vmem:[#allocation27_spill] sm:$0xff] %v1990_v42  ;;  %v2000_v56 = vld [vmem:[%s2663_s0 + $0xf0] sm:$0xff] }
  0x1c   :  { %v1470_v60 = vmin.f32 %v1876_v58, %v1469_v54  ;;  %v1197_v36 = vadd.f32 %v1196_v12, %v331_v55 }
  0x1e   :  { %v1471_v10 = vmin.f32 %v1890_v2, %v1470_v60  ;;  %v1397_v60 = vmax.f32 %v1737_v14, %v1396_v30  ;;  %v333_v30 = vmul.f32 %v1959_v62, %v1723_v9 }
  0x20   :  { %v1472_v24 = vmin.f32 %v1907_v18, %v1471_v10  ;;  %v332_v10 = vmul.f32 %v1943_v48, %v1717_v7  ;;  %v1398_v38 = vmax.f32 %v1763_v20, %v1397_v60  ;;  %v2005_v60 = vld [vmem:[%s2664_s1 + $0x80] sm:$0xff] }
  0x21   :  { %2730 = vst [vmem:[#allocation28_spill] sm:$0xff] %v2005_v60 }
  0x22   :  { %v1473_v41 = vmin.f32 %v1923_v34, %v1472_v24  ;;  %v454_v24 = vadd.f32 %v1844_v46, %v1852_v50  ;;  %v1198_v55 = vadd.f32 %v1197_v36, %v332_v10  ;;  %v335_v10 = vmul.f32 %v1990_v42, %v1737_v14  ;;  %v2023_v36 = vld [vmem:[%s2664_s1 + $0x88] sm:$0xff] }
  0x23   :  { %v1399_v26 = vmax.f32 %v1784_v27, %v1398_v38  ;;  %2732 = vst [vmem:[#allocation30_spill] sm:$0xff] %v2023_v36 }
  0x24   :  { %v1474_v54 = vmin.f32 %v1938_v47, %v1473_v41  ;;  %v1985_v41 = vld [vmem:[%s2663_s0 + $0xe8] sm:$0xff]  ;;  %v1259_v63 = vadd.f32 %v1258_v49, %v454_v24  ;;  %v1199_v12 = vadd.f32 %v1198_v55, %v333_v30  ;;  %v457_v24 = vadd.f32 %v1895_v4, %v1698_v1  ;;  %v2034_v55 = vld [vmem:[%s2664_s1 + $0x90] sm:$0xff] }
  0x25   :  { %v336_v30 = vmul.f32 %v2005_v60, %v1763_v20  ;;  %2733 = vst [vmem:[#allocation31_spill] sm:$0xff] %v2034_v55  ;;  %v337_v4 = vmul.f32 %v2023_v36, %v1784_v27 }
  0x26   :  { %v1475_v8 = vmin.f32 %v1954_v61, %v1474_v54  ;;  %v334_v54 = vmul.f32 %v1974_v23, %v1729_v11  ;;  %v1260_v49 = vadd.f32 %v1259_v63, %v455_v43  ;;  %v1400_v63 = vmax.f32 %v1802_v32, %v1399_v26 }
  0x28   :  { %v1476_v29 = vmin.f32 %v1969_v13, %v1475_v8  ;;  %v1200_v38 = vadd.f32 %v1199_v12, %v334_v54  ;;  %v1261_v53 = vadd.f32 %v1260_v49, %v456_v6  ;;  %v459_v54 = vadd.f32 %v1928_v35, %v1711_v5  ;;  %v2053_v6 = vld [vmem:[%s2664_s1 + $0xa0] sm:$0xff] }
  0x29   :  { %2735 = vst [vmem:[#allocation33_spill] sm:$0xff] %v2053_v6  ;;  %v1401_v35 = vmax.f32 %v1821_v39, %v1400_v63 }
  0x2a   :  { %v1477_v51 = vmin.f32 %v1985_v41, %v1476_v29  ;;  %v2018_v29 = vld [vmem:[%s2663_s0 + $0xf8] sm:$0xff]  ;;  %v1201_v43 = vadd.f32 %v1200_v38, %v335_v10  ;;  %v1262_v12 = vadd.f32 %v1261_v53, %v457_v24  ;;  %v460_v10 = vadd.f32 %v1943_v48, %v1717_v7  ;;  %v2063_v53 = vld [vmem:[%s2664_s1 + $0xa8] sm:$0xff] }
  0x2b   :  { %2736 = vst [vmem:[#allocation34_spill] sm:$0xff] %v2063_v53  ;;  %v461_v24 = vadd.f32 %v1959_v62, %v1723_v9  ;;  %v341_v63 = vmul.f32 %v2063_v53, %v1858_v52  ;;  %v1402_v62 = vmax.f32 %v1839_v45, %v1401_v35  ;;  %v464_v35 = vadd.f32 %v2005_v60, %v1763_v20 }
  0x2c   :  { %v2010_v8 = vmin.f32 %v2000_v56, %v1477_v51  ;;  %v2044_v51 = vld [vmem:[%s2664_s1 + $0x98] sm:$0xff]  ;;  %v1202_v22 = vadd.f32 %v1201_v43, %v336_v30  ;;  %v1263_v26 = vadd.f32 %v1262_v12, %v458_v59  ;;  %v340_v43 = vmul.f32 %v2053_v6, %v1839_v45  ;;  %v2072_v59 = vld [vmem:[%s2664_s1 + $0xb0] sm:$0xff] }
  0x2d   :  { %2734 = vst [vmem:[#allocation32_spill] sm:$0xff] %v2044_v51  ;;  %v339_v49 = vmul.f32 %v2044_v51, %v1821_v39  ;;  %2737 = vst [vmem:[#allocation35_spill] sm:$0xff] %v2072_v59 }
  0x2e   :  { %2731 = vst [vmem:[#allocation29_spill] sm:$0xff] %v2010_v8  ;;  %v338_v8 = vmul.f32 %v2034_v55, %v1802_v32  ;;  %v1203_v38 = vadd.f32 %v1202_v22, %v337_v4  ;;  %v1264_v30 = vadd.f32 %v1263_v26, %v459_v54  ;;  %v462_v4 = vadd.f32 %v1974_v23, %v1729_v11  ;;  %v2082_v54 = vld [vmem:[%s2664_s1 + $0xb8] sm:$0xff] }
  0x2f   :  { %2738 = vst [vmem:[#allocation36_spill] sm:$0xff] %v2082_v54 }
  0x30   :  { %v1204_v48 = vadd.f32 %v1203_v38, %v338_v8  ;;  %v1265_v22 = vadd.f32 %v1264_v30, %v460_v10  ;;  %v463_v8 = vadd.f32 %v1990_v42, %v1737_v14  ;;  %v342_v38 = vmul.f32 %v2072_v59, %v1876_v58  ;;  %v2091_v10 = vld [vmem:[%s2664_s1 + $0xc0] sm:$0xff] }
  0x31   :  { %2739 = vst [vmem:[#allocation37_spill] sm:$0xff] %v2091_v10  ;;  %v1403_v42 = vmax.f32 %v1858_v52, %v1402_v62  ;;  %v466_v62 = vadd.f32 %v2034_v55, %v1802_v32 }
  0x32   :  { %v1205_v12 = vadd.f32 %v1204_v48, %v339_v49  ;;  %v1266_v26 = vadd.f32 %v1265_v22, %v461_v24  ;;  %v343_v49 = vmul.f32 %v2082_v54, %v1890_v2  ;;  %v2101_v24 = vld [vmem:[%s2664_s1 + $0xc8] sm:$0xff] }
  0x33   :  { %2740 = vst [vmem:[#allocation38_spill] sm:$0xff] %v2101_v24 }
  0x34   :  { %v1206_v23 = vadd.f32 %v1205_v12, %v340_v43  ;;  %v1267_v48 = vadd.f32 %v1266_v26, %v462_v4  ;;  %v465_v43 = vadd.f32 %v2023_v36, %v1784_v27  ;;  %v344_v12 = vmul.f32 %v2091_v10, %v1907_v18  ;;  %v2110_v4 = vld [vmem:[%s2664_s1 + $0xd0] sm:$0xff] }
  0x35   :  { %2741 = vst [vmem:[#allocation39_spill] sm:$0xff] %v2110_v4  ;;  %v1404_v36 = vmax.f32 %v1876_v58, %v1403_v42  ;;  %v468_v42 = vadd.f32 %v2053_v6, %v1839_v45 }
  0x36   :  { %v1207_v30 = vadd.f32 %v1206_v23, %v341_v63  ;;  %v1268_v22 = vadd.f32 %v1267_v48, %v463_v8  ;;  %v345_v63 = vmul.f32 %v2101_v24, %v1923_v34  ;;  %v2120_v8 = vld [vmem:[%s2664_s1 + $0xd8] sm:$0xff] }
  0x37   :  { %2742 = vst [vmem:[#allocation40_spill] sm:$0xff] %v2120_v8 }
  0x38   :  { %v1208_v60 = vadd.f32 %v1207_v30, %v342_v38  ;;  %v1269_v23 = vadd.f32 %v1268_v22, %v464_v35  ;;  %v467_v38 = vadd.f32 %v2044_v51, %v1821_v39  ;;  %v346_v30 = vmul.f32 %v2110_v4, %v1938_v47  ;;  %v2129_v35 = vld [vmem:[%s2664_s1 + $0xe0] sm:$0xff] }
  0x39   :  { %2743 = vst [vmem:[#allocation41_spill] sm:$0xff] %v2129_v35  ;;  %v1405_v51 = vmax.f32 %v1890_v2, %v1404_v36  ;;  %v2150_v36 = vld [vmem:[%s2664_s1 + $0xf0] sm:$0xff] }
  0x3a   :  { %v1209_v26 = vadd.f32 %v1208_v60, %v343_v49  ;;  %v1270_v48 = vadd.f32 %v1269_v23, %v465_v43  ;;  %v347_v49 = vmul.f32 %v2120_v8, %v1954_v61  ;;  %v2139_v43 = vld [vmem:[%s2664_s1 + $0xe8] sm:$0xff]  ;;  %2745 = vst [vmem:[#allocation43_spill] sm:$0xff] %v2150_v36  ;;  %v478_v40 = vadd.f32 %v2150_v36, %v2000_v56 }
  0x3b   :  { %2744 = vst [vmem:[#allocation42_spill] sm:$0xff] %v2139_v43 }
  0x3c   :  { %v1210_v55 = vadd.f32 %v1209_v26, %v344_v12  ;;  %v1271_v60 = vadd.f32 %v1270_v48, %v466_v62  ;;  %v469_v12 = vadd.f32 %v2063_v53, %v1858_v52  ;;  %v348_v62 = vmul.f32 %v2129_v35, %v1969_v13 }
  0x3e   :  { %v1211_v22 = vadd.f32 %v1210_v55, %v345_v63  ;;  %v1272_v23 = vadd.f32 %v1271_v60, %v467_v38  ;;  %v470_v55 = vadd.f32 %v2072_v59, %v1876_v58  ;;  %v349_v38 = vmul.f32 %v2139_v43, %v1985_v41  ;;  %v2162_v60 = vld [vmem:[%s2664_s1 + $0xf8] sm:$0xff] }
  0x3f   :  { %2746 = vst [vmem:[#allocation44_spill] sm:$0xff] %v2162_v60 }
  0x40   :  { %v1212_v26 = vadd.f32 %v1211_v22, %v346_v30  ;;  %v1273_v63 = vadd.f32 %v1272_v23, %v468_v42  ;;  %v1406_v30 = vmax.f32 %v1907_v18, %v1405_v51  ;;  %v471_v22 = vadd.f32 %v2082_v54, %v1890_v2 }
  0x41   :  { %v350_v42 = vmul.f32 %v2150_v36, %v2000_v56  ;;  %v472_v51 = vadd.f32 %v2091_v10, %v1907_v18  ;;  %v479_v36 = vadd.f32 %v2162_v60, %v2018_v29 }
  0x42   :  { %v1213_v48 = vadd.f32 %v1212_v26, %v347_v49  ;;  %v1274_v59 = vadd.f32 %v1273_v63, %v469_v12  ;;  %v351_v26 = vmul.f32 %v2162_v60, %v2018_v29  ;;  %v1407_v12 = vmax.f32 %v1923_v34, %v1406_v30 }
  0x43   :  { %v473_v63 = vadd.f32 %v2101_v24, %v1923_v34  ;;  %v644_v24 = vsub.f32 1.0, %v1815_v37 }
  0x44   :  { %v1214_v23 = vadd.f32 %v1213_v48, %v348_v62  ;;  %v1275_v49 = vadd.f32 %v1274_v59, %v470_v55  ;;  %v2181_v59 = vpop.eup %1519  ;;  %v474_v55 = vadd.f32 %v2110_v4, %v1938_v47  ;;  %1551 = vlog2.f32 %v1763_v20 }
  0x45   :  { %v2258_v28 = vmul.f32 0.6931472, %v2181_v59 }
  0x46   :  { %v1215_v53 = vadd.f32 %v1214_v23, %v349_v38  ;;  %v1276_v62 = vadd.f32 %v1275_v49, %v471_v22  ;;  %v2186_v38 = vpop.eup %1521  ;;  %v1408_v22 = vmax.f32 %v1938_v47, %v1407_v12  ;;  %v640_v12 = vsub.f32 1.0, %v1752_v17 }
  0x47   :  { %v2189_v23 = vpop.eup %1523  ;;  %1553 = vlog2.f32 %v1784_v27 }
  0x48   :  { %v1216_v48 = vadd.f32 %v1215_v53, %v350_v42  ;;  %v1277_v10 = vadd.f32 %v1276_v62, %v472_v51  ;;  %v475_v53 = vadd.f32 %v2120_v8, %v1954_v61  ;;  %v2195_v49 = vpop.eup %1525  ;;  %v1409_v4 = vmax.f32 %v1954_v61, %v1408_v22 }
  0x49   :  { %v2198_v51 = vpop.eup %1527  ;;  %1555 = vlog2.f32 %v1802_v32 }
  0x4a   :  { %v1217_v30 = vadd.f32 %v1216_v48, %v351_v26  ;;  %v1278_v42 = vadd.f32 %v1277_v10, %v473_v63  ;;  %v476_v26 = vadd.f32 %v2129_v35, %v1969_v13  ;;  %v2204_v48 = vpop.eup %1529  ;;  %v641_v10 = vsub.f32 1.0, %v1758_v19 }
  0x4b   :  { %v642_v63 = vsub.f32 1.0, %v1778_v25  ;;  %v2210_v8 = vpop.eup %1531  ;;  %1557 = vlog2.f32 %v1821_v39  ;;  %v1410_v6 = vmax.f32 %v1969_v13, %v1409_v4 }
  0x4c   :  { %1218 = vadd.xlane.f32.xlu0 %v1217_v30  ;;  %v1279_v62 = vadd.f32 %v1278_v42, %v474_v55  ;;  %v643_v30 = vsub.f32 1.0, %v1797_v31  ;;  %v477_v55 = vadd.f32 %v2139_v43, %v1985_v41  ;;  %v1534_v35 = vpop.eup %1533  ;;  %1559 = vlog2.f32 %v1839_v45 }
  0x4d   :  { %v1536_v46 = vpop.eup %1535  ;;  %1561 = vlog2.f32 %v640_v12  ;;  %v1411_v12 = vmax.f32 %v1985_v41, %v1410_v6  ;;  %v2261_v6 = vmul.f32 0.6931472, %v2186_v38 }
  0x4e   :  { %v1280_v42 = vadd.f32 %v1279_v62, %v475_v53  ;;  %v1538_v62 = vpop.eup %1537  ;;  %1563 = vlog2.f32 %v641_v10 }
  0x4f   :  { %v1540_v31 = vpop.eup %1539  ;;  %1565 = vlog2.f32 %v1858_v52  ;;  %v2281_v38 = vmax.f32 %v2000_v56, %v1411_v12 }
  0x50   :  { %v1281_v22 = vadd.f32 %v1280_v42, %v476_v26  ;;  %v2232_v42 = vpop.eup %1541  ;;  %1567 = vlog2.f32 %v642_v63  ;;  %v2269_v63 = vmul.f32 0.6931472, %v2195_v49 }
  0x51   :  { %v1544_v33 = vpop.eup %1543  ;;  %1569 = vlog2.f32 %v1876_v58  ;;  %v2749_v58 = vsub.f32 1.0, %v1852_v50  ;;  %v2322_v12 = vmul.f32 0.6931472, %v2232_v42 }
  0x52   :  { %v1282_v26 = vadd.f32 %v1281_v22, %v477_v55  ;;  %v2239_v60 = vpop.eup %1545  ;;  %1571 = vlog2.f32 %v643_v30  ;;  %v2272_v22 = vmul.f32 0.6931472, %v2198_v51  ;;  %v2286_v30 = vmul.f32 0.6931472, %v1534_v35 }
  0x53   :  { %v2245_v53 = vpop.eup %1547  ;;  %1573 = vlog2.f32 %v1890_v2  ;;  %v2290_v51 = vmul.f32 0.6931472, %v1536_v46  ;;  %v2292_v55 = vmul.f32 0.6931472, %v1538_v62  ;;  %v2750_v62 = vsub.f32 1.0, %v1871_v57 }
  0x54   :  { %v1283_v54 = vadd.f32 %v1282_v26, %v478_v40  ;;  %v2249_v4 = vpop.eup %1549  ;;  %1575 = vlog2.f32 %v644_v24  ;;  %v2748_v24 = vsub.f32 1.0, %v1834_v44  ;;  %v2338_v42 = vmul.f32 0.6931472, %v2239_v60 }
  0x55   :  { %v2255_v21 = vpop.eup %1551  ;;  %1577 = vlog2.f32 %v1907_v18 }
  0x56   :  { %v1284_v40 = vadd.f32 %v1283_v54, %v479_v36  ;;  %v2264_v54 = vmul.f32 0.6931472, %v2189_v23  ;;  %v2266_v36 = vpop.eup %1553  ;;  %v2284_v23 = vmul.f32 0.6931472, %v2210_v8  ;;  %1579 = vlog2.f32 %v2748_v24 }
  0x57   :  { %v2278_v59 = vpop.eup %1555  ;;  %1581 = vlog2.f32 %v1923_v34  ;;  %v2324_v8 = vmul.f32 0.6931472, %v1544_v33  ;;  %v1387_v33 = vmax.f32 %v1752_v17, %v1815_v37  ;;  %v2765_v17 = vmax.f32 %v2018_v29, %v2281_v38 }
  0x58   :  { %1285 = vadd.xlane.f32.xlu1 %v1284_v40  ;;  %v2275_v40 = vmul.f32 0.6931472, %v2204_v48  ;;  %v2288_v49 = vpop.eup %1557  ;;  %v2294_v48 = vmul.f32 0.6931472, %v1540_v31  ;;  %1583 = vlog2.f32 %v2749_v58  ;;  %v2384_v58 = vmul.f32 0.6931472, %v2278_v59 }
  0x59   :  { %v2297_v10 = vpop.eup %1559  ;;  %1585 = vlog2.f32 %v2750_v62  ;;  %v2751_v62 = vsub.f32 1.0, %v1693_v0  ;;  %v2753_v0 = vsub.f32 1.0, %v1698_v1 }
  0x5a   :  { %2747 = vst [vmem:[#allocation45_spill] sm:$0xff] %v2294_v48  ;;  %v1562_v26 = vpop.eup %1561  ;;  %1587 = vlog2.f32 %v1938_v47 }
  0x5b   :  { %v1564_v43 = vpop.eup %1563  ;;  %v2331_v46 = vmul.f32 0.6931472, %v1562_v26  ;;  %1589 = vlog2.f32 %v2751_v62  ;;  %v2346_v26 = vmul.f32 0.6931472, %v2245_v53  ;;  %v2354_v62 = vmul.f32 0.6931472, %v2249_v4 }
  0x5c   :  { %v2314_v24 = vpop.eup %1565  ;;  %v2333_v31 = vmul.f32 0.6931472, %v1564_v43  ;;  %1591 = vlog2.f32 %v1954_v61  ;;  %v2368_v4 = vmul.f32 0.6931472, %v2255_v21  ;;  %v2371_v61 = vmul.f32 0.6931472, %v2266_v36 }
  0x5d   :  { %v1568_v45 = vpop.eup %1567  ;;  %1593 = vlog2.f32 %v2753_v0  ;;  %v736_v1 = vmax.f32 %v2331_v46, -100.0  ;;  %v2757_v46 = vsub.f32 1.0, %v1711_v5  ;;  %v2401_v36 = vmul.f32 0.6931472, %v2288_v49 }
  0x5e   :  { %v2328_v35 = vpop.eup %1569  ;;  %v2349_v52 = vmul.f32 0.6931472, %v1568_v45  ;;  %1595 = vlog2.f32 %v1969_v13  ;;  %v2755_v45 = vsub.f32 1.0, %v1705_v3  ;;  %v737_v0 = vmax.f32 %v2333_v31, -100.0 }
  0x5f   :  { %v1572_v48 = vpop.eup %1571 }
  0x60   :  { %v2343_v2 = vpop.eup %1573  ;;  %v2361_v53 = vmul.f32 0.6931472, %v1572_v48  ;;  %1597 = vlog2.f32 %v2755_v45  ;;  %v738_v31 = vmax.f32 %v2349_v52, -100.0 }
  0x61   :  { %2752 = vst [vmem:[#allocation46_spill] sm:$0xff] %v2343_v2  ;;  %v1576_v60 = vpop.eup %1575  ;;  %1599 = vlog2.f32 %v1985_v41 }
  0x62   :  { %v2359_v47 = vpop.eup %1577  ;;  %v2378_v45 = vmul.f32 0.6931472, %v1576_v60  ;;  %1601 = vlog2.f32 %v2757_v46  ;;  %v739_v5 = vmax.f32 %v2361_v53, -100.0  ;;  %v2759_v46 = vmax.f32 %v2258_v28, -100.0 }
  0x63   :  { %2754 = vst [vmem:[#allocation47_spill] sm:$0xff] %v2359_v47  ;;  %v1580_v43 = vpop.eup %1579  ;;  %v2758_v47 = vsub.f32 1.0, %v1717_v7  ;;  %v2761_v28 = vsub.f32 1.0, %v1723_v9  ;;  %v1388_v9 = vmax.f32 %v1758_v19, %v1834_v44  ;;  %v1389_v19 = vmax.f32 %v1778_v25, %v1852_v50 }
  0x64   :  { %v2375_v48 = vpop.eup %1581  ;;  %v2391_v60 = vmul.f32 0.6931472, %v1580_v43  ;;  %v800_v52 = vsub.f32 %v2759_v46, %v736_v1  ;;  %v2762_v43 = vmax.f32 %v2264_v54, -100.0  ;;  %v2764_v46 = vsub.f32 1.0, %v1729_v11 }
  0x65   :  { %2756 = vst [vmem:[#allocation48_spill] sm:$0xff] %v2375_v48  ;;  %v1584_v21 = vpop.eup %1583  ;;  %1603 = vlog2.f32 %v2758_v47  ;;  %v2760_v48 = vmax.f32 %v2261_v6, -100.0  ;;  %v740_v6 = vmax.f32 %v2378_v45, -100.0  ;;  %v2766_v54 = vmax.f32 %v2269_v63, -100.0 }
  0x66   :  { %v1586_v3 = vpop.eup %1585  ;;  %1605 = vlog2.f32 %v2000_v56  ;;  %v2406_v47 = vmul.f32 0.6931472, %v1584_v21  ;;  %v802_v53 = vsub.f32 %v2762_v43, %v738_v31  ;;  %v1414_v21 = vmax.f32 %v1387_v33, %v2765_v17 }
  0x67   :  { %v801_v59 = vsub.f32 %v2760_v48, %v737_v0  ;;  %v2398_v2 = vpop.eup %1587  ;;  %1607 = vlog2.f32 %v2761_v28  ;;  %v2415_v49 = vmul.f32 0.6931472, %v1586_v3  ;;  %v741_v45 = vmax.f32 %v2391_v60, -100.0  ;;  %v2769_v60 = vld [vmem:[#allocation7_spill] sm:$0xff] }
  0x68   :  { %v1590_v37 = vpop.eup %1589  ;;  %1609 = vlog2.f32 %v2764_v46  ;;  %v803_v43 = vsub.f32 %v2766_v54, %v739_v5  ;;  %v832_v7 = vmul.f32 %v800_v52, %v1742_v15  ;;  %v2432_v11 = vmul.f32 0.6931472, %v2297_v10 }
  0x69   :  { %v2413_v48 = vpop.eup %1591  ;;  %v833_v3 = vmul.f32 %v801_v59, %v1747_v16  ;;  %1611 = vlog2.f32 %v2018_v29  ;;  %v2435_v38 = vmul.f32 0.6931472, %v1590_v37  ;;  %v2767_v63 = vsub.f32 1.0, %v1737_v14 }
  0x6a   :  { %2763 = vst [vmem:[#allocation49_spill] sm:$0xff] %v2413_v48  ;;  %v1594_v28 = vpop.eup %1593  ;;  %v742_v15 = vmax.f32 %v2406_v47, -100.0  ;;  %v2768_v16 = vmax.f32 %v2272_v22, -100.0  ;;  %v834_v52 = vmul.f32 %v802_v53, %v2769_v60  ;;  %v2770_v17 = vsub.f32 1.0, %v1763_v20  ;;  %v2772_v47 = vld [vmem:[#allocation8_spill] sm:$0xff]  ;;  %v2773_v20 = vld [vmem:[#allocation9_spill] sm:$0xff] }
  0x6b   :  { %v2429_v48 = vpop.eup %1595  ;;  %1613 = vlog2.f32 %v2767_v63  ;;  %v2447_v59 = vmul.f32 0.6931472, %v1594_v28  ;;  %v743_v25 = vmax.f32 %v2415_v49, -100.0  ;;  %v1415_v50 = vmax.f32 %v1388_v9, %v1414_v21  ;;  %v2776_v9 = vld [vmem:[#allocation10_spill] sm:$0xff] }
  0x6c   :  { %v1598_v44 = vpop.eup %1597  ;;  %v804_v33 = vsub.f32 %v2768_v16, %v740_v6  ;;  %1615 = vlog2.f32 %v2770_v17  ;;  %v2771_v14 = vmax.f32 %v2275_v40, -100.0  ;;  %v835_v54 = vmul.f32 %v803_v43, %v2772_v47 }
  0x6d   :  { %v2445_v10 = vpop.eup %1599  ;;  %v864_v22 = vadd.f32 %v832_v7, %v736_v1  ;;  %v865_v63 = vadd.f32 %v833_v3, %v737_v0  ;;  %v626_v53 = vmax.f32 %v2384_v58, -100.0  ;;  %v2456_v60 = vmul.f32 0.6931472, %v1598_v44 }
  0x6e   :  { %v1602_v37 = vpop.eup %1601  ;;  %v805_v46 = vsub.f32 %v2771_v14, %v741_v45  ;;  %v744_v28 = vmax.f32 %v2435_v38, -100.0  ;;  %v1390_v17 = vmax.f32 %v2773_v20, %v1871_v57  ;;  %v2774_v49 = vsub.f32 1.0, %v1784_v27  ;;  %v2779_v14 = vld [vmem:[#allocation11_spill] sm:$0xff] }
  0x6f   :  { %v1604_v16 = vpop.eup %1603  ;;  %v2775_v40 = vmax.f32 %v2284_v23, -100.0  ;;  %v836_v43 = vmul.f32 %v804_v33, %v2776_v9  ;;  %v866_v1 = vadd.f32 %v834_v52, %v738_v31  ;;  %v2468_v7 = vmul.f32 0.6931472, %v1602_v37 }
  0x70   :  { %1617 = vlog2.f32 %v2774_v49  ;;  %v2466_v0 = vpop.eup %1605  ;;  %v2777_v3 = vsub.f32 1.0, %v1802_v32  ;;  %v745_v38 = vmax.f32 %v2447_v59, -100.0  ;;  %v2778_v57 = vmax.f32 %v2286_v30, -100.0 }
  0x71   :  { %v806_v21 = vsub.f32 %v2775_v40, %v742_v15  ;;  %v1608_v27 = vpop.eup %1607  ;;  %v837_v47 = vmul.f32 %v805_v46, %v2779_v14  ;;  %v867_v23 = vadd.f32 %v835_v54, %v739_v5  ;;  %v1320_v20 = vadd.f32 %v865_v63, %v864_v22  ;;  %v2782_v40 = vld [vmem:[#allocation13_spill] sm:$0xff] }
  0x72   :  { %1619 = vlog2.f32 %v2777_v3  ;;  %v807_v44 = vsub.f32 %v2778_v57, %v743_v25  ;;  %v1416_v49 = vmax.f32 %v1389_v19, %v1415_v50  ;;  %v1610_v33 = vpop.eup %1609  ;;  %v2476_v31 = vmul.f32 0.6931472, %v1604_v16  ;;  %v2783_v50 = vld [vmem:[#allocation12_spill] sm:$0xff]  ;;  %v2786_v16 = vld [vmem:[#allocation15_spill] sm:$0xff] }
  0x73   :  { %v2780_v52 = vsub.f32 1.0, %v1821_v39  ;;  %v746_v32 = vmax.f32 %v2456_v60, -100.0  ;;  %v2781_v37 = vmax.f32 %v2290_v51, -100.0  ;;  %v838_v30 = vmul.f32 %v806_v21, %v2782_v40  ;;  %v2484_v46 = vpop.eup %1611 }
  0x74   :  { %v868_v9 = vadd.f32 %v836_v43, %v740_v6  ;;  %v1321_v3 = vadd.f32 %v1320_v20, %v866_v1  ;;  %v1417_v57 = vmax.f32 %v1390_v17, %v1416_v49  ;;  %v2487_v5 = vmul.f32 0.6931472, %v2314_v24  ;;  %v2787_v1 = vld [vmem:[#allocation14_spill] sm:$0xff] }
  0x75   :  { %1621 = vlog2.f32 %v2780_v52  ;;  %v808_v59 = vsub.f32 %v2781_v37, %v744_v28  ;;  %v2489_v19 = vmul.f32 0.6931472, %v1608_v27  ;;  %v2784_v39 = vsub.f32 1.0, %v2783_v50  ;;  %v1614_v22 = vpop.eup %1613  ;;  %v2795_v50 = vld [vmem:[#allocation19_spill] sm:$0xff] }
  0x76   :  { %v747_v54 = vmax.f32 %v2468_v7, -100.0  ;;  %v2785_v51 = vmax.f32 %v2292_v55, -100.0  ;;  %v839_v6 = vmul.f32 %v807_v44, %v2786_v16  ;;  %v869_v60 = vadd.f32 %v837_v47, %v741_v45  ;;  %1418 = vmax.xlane.f32.xlu1 %v1417_v57  ;;  %v1616_v21 = vpop.eup %1615  ;;  %v2789_v7 = vld [vmem:[#allocation45_spill] sm:$0xff] }
  0x77   :  { %1623 = vlog2.f32 %v2784_v39  ;;  %v1322_v17 = vadd.f32 %v1321_v3, %v867_v23  ;;  %v627_v24 = vmax.f32 %v2401_v36, -100.0  ;;  %v2498_v43 = vmul.f32 0.6931472, %v1610_v33  ;;  %v2791_v55 = vld [vmem:[#allocation17_spill] sm:$0xff]  ;;  %v2792_v23 = vld [vmem:[#allocation16_spill] sm:$0xff] }
  0x78   :  { %v809_v63 = vsub.f32 %v2785_v51, %v745_v38  ;;  %v2788_v27 = vsub.f32 1.0, %v2787_v1  ;;  %v748_v14 = vmax.f32 %v2476_v31, -100.0  ;;  %v2790_v20 = vmax.f32 %v2789_v7, -100.0 }
  0x79   :  { %v840_v52 = vmul.f32 %v808_v59, %v2791_v55  ;;  %v870_v37 = vadd.f32 %v838_v30, %v742_v15  ;;  %v1323_v44 = vadd.f32 %v1322_v17, %v868_v9  ;;  %v668_v45 = vsub.f32 1.0, %v1969_v13  ;;  %v2796_v30 = vld [vmem:[#allocation18_spill] sm:$0xff] }
  0x7a   :  { %1625 = vlog2.f32 %v2788_v27  ;;  %v810_v49 = vsub.f32 %v2790_v20, %v746_v32  ;;  %v2507_v47 = vmul.f32 0.6931472, %v1614_v22  ;;  %v2793_v40 = vsub.f32 1.0, %v2792_v23  ;;  %v1618_v3 = vpop.eup %1617  ;;  %v2802_v20 = vld [vmem:[#allocation21_spill] sm:$0xff] }
  0x7b   :  { %v749_v33 = vmax.f32 %v2489_v19, -100.0  ;;  %v2794_v57 = vmax.f32 %v2322_v12, -100.0  ;;  %v841_v39 = vmul.f32 %v809_v63, %v2795_v50  ;;  %v871_v51 = vadd.f32 %v839_v6, %v743_v25  ;;  %v2799_v12 = vld [vmem:[#allocation20_spill] sm:$0xff] }
  0x7c   :  { %1627 = vlog2.f32 %v2793_v40  ;;  %v1324_v16 = vadd.f32 %v1323_v44, %v869_v60  ;;  %v1620_v59 = vpop.eup %1619  ;;  %v2516_v15 = vmul.f32 0.6931472, %v2328_v35  ;;  %v2518_v13 = vmul.f32 0.6931472, %v1616_v21  ;;  %v2805_v40 = vld [vmem:[#allocation23_spill] sm:$0xff] }
  0x7d   :  { %v811_v31 = vsub.f32 %v2794_v57, %v747_v54  ;;  %v2797_v9 = vsub.f32 1.0, %v2796_v30  ;;  %v750_v22 = vmax.f32 %v2498_v43, -100.0  ;;  %v2798_v19 = vmax.f32 %v2324_v8, -100.0 }
  0x7e   :  { %v842_v1 = vmul.f32 %v810_v49, %v2799_v12  ;;  %v872_v27 = vadd.f32 %v840_v52, %v744_v28  ;;  %v1325_v63 = vadd.f32 %v1324_v16, %v870_v37  ;;  %v628_v6 = vmax.f32 %v2432_v11, -100.0  ;;  %v2811_v12 = vld [vmem:[#allocation24_spill] sm:$0xff] }
  0x7f   :  { %1629 = vlog2.f32 %v2797_v9  ;;  %v812_v17 = vsub.f32 %v2798_v19, %v748_v14  ;;  %v1622_v25 = vpop.eup %1621  ;;  %v2527_v60 = vmul.f32 0.6931472, %v1618_v3  ;;  %v2800_v35 = vsub.f32 1.0, %v1907_v18 }
  0x80   :  { %v751_v21 = vmax.f32 %v2507_v47, -100.0  ;;  %v2801_v7 = vmax.f32 %v2338_v42, -100.0  ;;  %v843_v8 = vmul.f32 %v811_v31, %v2802_v20  ;;  %v873_v55 = vadd.f32 %v841_v39, %v745_v38  ;;  %v2806_v38 = vld [vmem:[#allocation46_spill] sm:$0xff] }
  0x81   :  { %1631 = vlog2.f32 %v2800_v35  ;;  %v1326_v44 = vadd.f32 %v1325_v63, %v871_v51  ;;  %v1624_v49 = vpop.eup %1623  ;;  %v669_v28 = vsub.f32 1.0, %v1985_v41  ;;  %v2536_v52 = vmul.f32 0.6931472, %v1620_v59  ;;  %v2807_v41 = vld [vmem:[#allocation22_spill] sm:$0xff] }
  0x82   :  { %v813_v43 = vsub.f32 %v2801_v7, %v749_v33  ;;  %v2803_v37 = vsub.f32 1.0, %v1923_v34  ;;  %v752_v18 = vmax.f32 %v2518_v13, -100.0  ;;  %v2804_v23 = vmax.f32 %v2346_v26, -100.0  ;;  %v2810_v26 = vld [vmem:[#allocation25_spill] sm:$0xff] }
  0x83   :  { %v844_v42 = vmul.f32 %v812_v17, %v2805_v40  ;;  %v874_v3 = vadd.f32 %v842_v1, %v746_v32  ;;  %v1327_v57 = vadd.f32 %v1326_v44, %v872_v27  ;;  %v2545_v50 = vmul.f32 0.6931472, %v2806_v38  ;;  %v2816_v44 = vld [vmem:[#allocation27_spill] sm:$0xff] }
  0x84   :  { %1633 = vlog2.f32 %v2803_v37  ;;  %v814_v47 = vsub.f32 %v2804_v23, %v750_v22  ;;  %v1626_v31 = vpop.eup %1625  ;;  %v2547_v39 = vmul.f32 0.6931472, %v1622_v25  ;;  %v2808_v51 = vsub.f32 1.0, %v2807_v41 }
  0x85   :  { %v753_v34 = vmax.f32 %v2527_v60, -100.0  ;;  %v2809_v16 = vmax.f32 %v2354_v62, -100.0  ;;  %v845_v13 = vmul.f32 %v813_v43, %v2810_v26  ;;  %v875_v30 = vadd.f32 %v843_v8, %v747_v54  ;;  %v2814_v60 = vld [vmem:[#allocation26_spill] sm:$0xff] }
  0x86   :  { %1635 = vlog2.f32 %v2808_v51  ;;  %v1328_v9 = vadd.f32 %v1327_v57, %v873_v55  ;;  %v1628_v32 = vpop.eup %1627  ;;  %v629_v19 = vmax.f32 %v2487_v5, -100.0  ;;  %v2556_v17 = vmul.f32 0.6931472, %v1624_v49  ;;  %v2818_v57 = vld [vmem:[#allocation47_spill] sm:$0xff] }
  0x87   :  { %v815_v59 = vsub.f32 %v2809_v16, %v751_v21  ;;  %v2812_v1 = vsub.f32 1.0, %v2811_v12  ;;  %v754_v27 = vmax.f32 %v2536_v52, -100.0  ;;  %v2813_v63 = vmax.f32 %v2368_v4, -100.0 }
  0x88   :  { %v846_v62 = vmul.f32 %v814_v47, %v2814_v60  ;;  %v876_v35 = vadd.f32 %v844_v42, %v748_v14  ;;  %v1329_v7 = vadd.f32 %v1328_v9, %v874_v3  ;;  %v670_v54 = vsub.f32 1.0, %v2000_v56  ;;  %v2817_v47 = vld [vmem:[#allocation28_spill] sm:$0xff] }
  0x89   :  { %1637 = vlog2.f32 %v2812_v1  ;;  %v816_v25 = vsub.f32 %v2813_v63, %v752_v18  ;;  %v1630_v43 = vpop.eup %1629  ;;  %v2565_v20 = vmul.f32 0.6931472, %v1626_v31  ;;  %v755_v5 = vmax.f32 %v2547_v39, -100.0  ;;  %v2819_v39 = vld [vmem:[#allocation30_spill] sm:$0xff]  ;;  %v2822_v63 = vld [vmem:[#allocation32_spill] sm:$0xff] }
  0x8a   :  { %1639 = vlog2.f32 %v668_v45  ;;  %v2815_v8 = vmax.f32 %v2371_v61, -100.0  ;;  %v847_v49 = vmul.f32 %v815_v59, %v2816_v44  ;;  %v877_v52 = vadd.f32 %v845_v13, %v749_v33  ;;  %v2820_v13 = vld [vmem:[#allocation31_spill] sm:$0xff]  ;;  %v2824_v44 = vld [vmem:[#allocation49_spill] sm:$0xff] }
  0x8b   :  { %v1330_v4 = vadd.f32 %v1329_v7, %v875_v30  ;;  %v1632_v37 = vpop.eup %1631  ;;  %v671_v23 = vsub.f32 1.0, %v2018_v29  ;;  %v2572_v14 = vmul.f32 0.6931472, %v1628_v32  ;;  %1641 = vlog2.f32 %v669_v28  ;;  %v2821_v32 = vld [vmem:[#allocation48_spill] sm:$0xff] }
  0x8c   :  { %v817_v55 = vsub.f32 %v2815_v8, %v753_v34  ;;  %v756_v56 = vmax.f32 %v2556_v17, -100.0  ;;  %v818_v45 = vsub.f32 %v626_v53, %v754_v27  ;;  %v848_v40 = vmul.f32 %v816_v25, %v2817_v47 }
  0x8d   :  { %v878_v42 = vadd.f32 %v846_v62, %v750_v22  ;;  %v1331_v61 = vadd.f32 %v1330_v4, %v876_v35  ;;  %v593_v31 = vmul.f32 0.6931472, %v2818_v57  ;;  %v2579_v33 = vmul.f32 0.6931472, %v1630_v43 }
  0x8e   :  { %v1634_v3 = vpop.eup %1633  ;;  %1643 = vlog2.f32 %v670_v54  ;;  %v757_v38 = vmax.f32 %v2565_v20, -100.0  ;;  %v819_v28 = vsub.f32 %v627_v24, %v755_v5  ;;  %v849_v41 = vmul.f32 %v817_v55, %v2819_v39  ;;  %v2823_v54 = vld [vmem:[#allocation33_spill] sm:$0xff] }
  0x8f   :  { %v879_v51 = vadd.f32 %v847_v49, %v751_v21  ;;  %v1332_v58 = vadd.f32 %v1331_v61, %v877_v52  ;;  %v630_v16 = vmax.f32 %v2516_v15, -100.0  ;;  %v2586_v22 = vmul.f32 0.6931472, %v1632_v37  ;;  %v2825_v37 = vld [vmem:[#allocation34_spill] sm:$0xff] }
  0x90   :  { %v1636_v53 = vpop.eup %1635  ;;  %1645 = vlog2.f32 %v671_v23  ;;  %v758_v59 = vmax.f32 %v2572_v14, -100.0  ;;  %v820_v26 = vsub.f32 %v628_v6, %v756_v56  ;;  %v850_v30 = vmul.f32 %v818_v45, %v2820_v13 }
  0x91   :  { %v880_v9 = vadd.f32 %v848_v40, %v752_v18  ;;  %v1333_v36 = vadd.f32 %v1332_v58, %v878_v42  ;;  %v595_v17 = vmul.f32 0.6931472, %v2821_v32  ;;  %v631_v21 = vmax.f32 %v2545_v50, -100.0 }
  0x92   :  { %v2594_v12 = vmul.f32 0.6931472, %v1634_v3  ;;  %v759_v15 = vmax.f32 %v2579_v33, -100.0  ;;  %v821_v1 = vsub.f32 %v629_v19, %v757_v38  ;;  %v851_v25 = vmul.f32 %v819_v28, %v2822_v63  ;;  %v2826_v3 = vld [vmem:[#allocation35_spill] sm:$0xff] }
  0x93   :  { %v1638_v24 = vpop.eup %1637  ;;  %v881_v60 = vadd.f32 %v849_v41, %v753_v34  ;;  %v1334_v62 = vadd.f32 %v1333_v36, %v879_v51  ;;  %v597_v6 = vmul.f32 0.6931472, %v2398_v2  ;;  %v632_v35 = vmax.f32 %v593_v31, -100.0 }
  0x94   :  { %v1640_v11 = vpop.eup %1639  ;;  %v2599_v18 = vmul.f32 0.6931472, %v1636_v53  ;;  %v760_v7 = vmax.f32 %v2586_v22, -100.0  ;;  %v822_v43 = vsub.f32 %v630_v16, %v758_v59  ;;  %v852_v50 = vmul.f32 %v820_v26, %v2823_v54  ;;  %v2827_v53 = vld [vmem:[#allocation36_spill] sm:$0xff] }
  0x95   :  { %v882_v20 = vadd.f32 %v850_v30, %v754_v27  ;;  %v1335_v8 = vadd.f32 %v1334_v62, %v880_v9  ;;  %v1642_v55 = vpop.eup %1641  ;;  %v599_v19 = vmul.f32 0.6931472, %v2824_v44  ;;  %v633_v49 = vmax.f32 %v595_v17, -100.0 }
  0x96   :  { %v727_v52 = vmul.f32 0.6931472, %v1638_v24  ;;  %v761_v34 = vmax.f32 %v2594_v12, -100.0  ;;  %v823_v4 = vsub.f32 %v631_v21, %v759_v15  ;;  %v853_v2 = vmul.f32 %v821_v1, %v2825_v37  ;;  %v2828_v24 = vld [vmem:[#allocation37_spill] sm:$0xff] }
  0x97   :  { %v883_v23 = vadd.f32 %v851_v25, %v755_v5  ;;  %v1336_v14 = vadd.f32 %v1335_v8, %v881_v60  ;;  %v601_v47 = vmul.f32 0.6931472, %v2429_v48  ;;  %v634_v40 = vmax.f32 %v597_v6, -100.0  ;;  %v2829_v25 = vld [vmem:[#allocation38_spill] sm:$0xff]  ;;  %v2831_v8 = vld [vmem:[#allocation40_spill] sm:$0xff] }
  0x98   :  { %v1644_v45 = vpop.eup %1643  ;;  %v729_v42 = vmul.f32 0.6931472, %v1640_v11  ;;  %v762_v27 = vmax.f32 %v2599_v18, -100.0  ;;  %v824_v61 = vsub.f32 %v632_v35, %v760_v7  ;;  %v854_v57 = vmul.f32 %v822_v43, %v2826_v3  ;;  %v2830_v35 = vld [vmem:[#allocation39_spill] sm:$0xff] }
  0x99   :  { %v884_v31 = vadd.f32 %v852_v50, %v756_v56  ;;  %v1337_v33 = vadd.f32 %v1336_v14, %v882_v20  ;;  %v603_v39 = vmul.f32 0.6931472, %v2445_v10  ;;  %v635_v41 = vmax.f32 %v599_v19, -100.0  ;;  %v1647_v19 = vld [vmem:[%s2663_s0] sm:$0xff]  ;;  %v2833_v14 = vld [vmem:[#allocation42_spill] sm:$0xff] }
  0x9a   :  { %v1646_v28 = vpop.eup %1645  ;;  %v731_v51 = vmul.f32 0.6931472, %v1642_v55  ;;  %v763_v58 = vmax.f32 %v727_v52, -100.0  ;;  %v825_v5 = vsub.f32 %v633_v49, %v761_v34  ;;  %v855_v16 = vmul.f32 %v823_v4, %v2827_v53  ;;  %v2832_v4 = vld [vmem:[#allocation41_spill] sm:$0xff]  ;;  %v2836_v3 = vld [vmem:[#allocation43_spill] sm:$0xff] }
  0x9b   :  { %v885_v22 = vadd.f32 %v853_v2, %v757_v38  ;;  %v1338_v48 = vadd.f32 %v1337_v33, %v883_v23  ;;  %v605_v26 = vmul.f32 0.6931472, %v2466_v0  ;;  %v636_v13 = vmax.f32 %v601_v47, -100.0 }
  0x9c   :  { %v733_v30 = vmul.f32 0.6931472, %v1644_v45  ;;  %v764_v9 = vmax.f32 %v729_v42, -100.0  ;;  %v826_v36 = vsub.f32 %v634_v40, %v762_v27  ;;  %v856_v56 = vmul.f32 %v824_v61, %v2828_v24  ;;  %v2834_v40 = vld [vmem:[#allocation29_spill] sm:$0xff]  ;;  %v1653_v24 = vld [vmem:[%s2663_s0 + $0x18] sm:$0xff] }
  0x9d   :  { %v886_v32 = vadd.f32 %v854_v57, %v758_v59  ;;  %v1339_v17 = vadd.f32 %v1338_v48, %v884_v31  ;;  %v607_v10 = vmul.f32 0.6931472, %v2484_v46  ;;  %v637_v21 = vmax.f32 %v603_v39, -100.0  ;;  %v1652_v48 = vld [vmem:[%s2663_s0 + $0x30] sm:$0xff] }
  0x9e   :  { %v735_v12 = vmul.f32 0.6931472, %v1646_v28  ;;  %v765_v1 = vmax.f32 %v731_v51, -100.0  ;;  %v827_v63 = vsub.f32 %v635_v41, %v763_v58  ;;  %v857_v60 = vmul.f32 %v825_v5, %v2829_v25  ;;  %v1649_v28 = vld [vmem:[%s2663_s0 + $0x8] sm:$0xff] }
  0x9f   :  { %v887_v38 = vadd.f32 %v855_v16, %v759_v15  ;;  %v1340_v62 = vadd.f32 %v1339_v17, %v885_v22  ;;  %v638_v11 = vmax.f32 %v605_v26, -100.0  ;;  %v766_v0 = vmax.f32 %v733_v30, -100.0  ;;  %v1648_v15 = vld [vmem:[%s2663_s0 + $0x20] sm:$0xff]  ;;  %v2837_v41 = vld [vmem:[#allocation44_spill] sm:$0xff]  ;;  %v1651_v22 = vld [vmem:[%s2663_s0 + $0x10] sm:$0xff] }
  0xa0   :  { %v828_v6 = vsub.f32 %v636_v13, %v764_v9  ;;  %v858_v18 = vmul.f32 %v826_v36, %v2830_v35  ;;  %v888_v43 = vadd.f32 %v856_v56, %v760_v7  ;;  %v639_v50 = vmax.f32 %v607_v10, -100.0  ;;  %v1654_v56 = vld [vmem:[%s2663_s0 + $0x38] sm:$0xff] }
  0xa1   :  { %v1341_v54 = vadd.f32 %v1340_v62, %v886_v32  ;;  %v767_v59 = vmax.f32 %v735_v12, -100.0  ;;  %v829_v20 = vsub.f32 %v637_v21, %v765_v1  ;;  %v859_v46 = vmul.f32 %v827_v63, %v2831_v8 }
  0xa2   :  { %v889_v55 = vadd.f32 %v857_v60, %v761_v34  ;;  %v1453_v49 = vmin.f32 %v1647_v19, %v1648_v15  ;;  %v830_v52 = vsub.f32 %v638_v11, %v766_v0  ;;  %v860_v7 = vmul.f32 %v828_v6, %v2832_v4 }
  0xa3   :  { %v1342_v44 = vadd.f32 %v1341_v54, %v887_v38  ;;  %v890_v37 = vadd.f32 %v858_v18, %v762_v27  ;;  %v831_v23 = vsub.f32 %v639_v50, %v767_v59  ;;  %v861_v45 = vmul.f32 %v829_v20, %v2833_v14  ;;  %v1650_v27 = vld [vmem:[%s2663_s0 + $0x28] sm:$0xff] }
  0xa4   :  { %v891_v47 = vadd.f32 %v859_v46, %v763_v58  ;;  %v2835_v42 = vmin.f32 %v2018_v29, %v2834_v40  ;;  %v862_v57 = vmul.f32 %v830_v52, %v2836_v3  ;;  %v892_v31 = vadd.f32 %v860_v7, %v764_v9 }
  0xa5   :  { %v1343_v2 = vadd.f32 %v1342_v44, %v888_v43  ;;  %v1454_v39 = vmin.f32 %v1649_v28, %v1650_v27  ;;  %v863_v51 = vmul.f32 %v831_v23, %v2837_v41  ;;  %v893_v58 = vadd.f32 %v861_v45, %v765_v1 }
  0xa6   :  { %v1480_v61 = vmin.f32 %v1453_v49, %v2835_v42  ;;  %v894_v53 = vadd.f32 %v862_v57, %v766_v0  ;;  %v1455_v26 = vmin.f32 %v1651_v22, %v1652_v48  ;;  %v1456_v32 = vmin.f32 %v1653_v24, %v1654_v56 }
  0xa7   :  { %v1344_v34 = vadd.f32 %v1343_v2, %v889_v55  ;;  %v895_v13 = vadd.f32 %v863_v51, %v767_v59 }
  0xa8   :  { %v1481_v16 = vmin.f32 %v1454_v39, %v1480_v61 }
  0xa9   :  { %v1345_v33 = vadd.f32 %v1344_v34, %v890_v37 }
  0xaa   :  { %v1482_v36 = vmin.f32 %v1455_v26, %v1481_v16 }
  0xab   :  { %v1346_v5 = vadd.f32 %v1345_v33, %v891_v47 }
  0xac   :  { %v1483_v10 = vmin.f32 %v1456_v32, %v1482_v36 }
  0xad   :  { %v1347_v29 = vadd.f32 %v1346_v5, %v892_v31 }
  0xaf   :  { %v1348_v30 = vadd.f32 %v1347_v29, %v893_v58 }
  0xb1   :  { %v1349_v9 = vadd.f32 %v1348_v30, %v894_v53 }
  0xb3   :  { %v1350_v17 = vadd.f32 %v1349_v9, %v895_v13 }
  0xb5   :  { %1351 = vadd.xlane.f32.xlu0 %v1350_v17 }
  0xb9   :  { %1484 = vmin.xlane.f32.xlu0 %v1483_v10 }
  0xd9   :  { %v1219_v21 = vpop.xlane.xlu0 %1218 }
  0xda   :  { %1221 = vst.msk [vmem:[%s2665_s2] sm:$0xff] %vm1220_vm0, %v1219_v21 }
  0xe5   :  { %v1286_v12 = vpop.xlane.xlu1 %1285 }
  0xe6   :  { %1287 = vst.msk [vmem:[%s2666_s3] sm:$0xff] %vm1220_vm0, %v1286_v12 }
 0x103   :  { %v1419_v1 = vpop.xlane.xlu1 %1418 }
 0x104   :  { %1420 = vst.msk [vmem:[%s2667_s5] sm:$0xff] %vm1220_vm0, %v1419_v1 }
 0x142   :  { %v1352_v63 = vpop.xlane.xlu0 %1351 }
 0x143   :  { %v1353_v25 = vsub.f32 0.0, %v1352_v63 }
 0x145   :  { %1354 = vst.msk [vmem:[%s2668_s4] sm:$0xff] %vm1220_vm0, %v1353_v25 }
 0x146   :  { %v1485_v60 = vpop.xlane.xlu0 %1484 }
 0x147   :  { %1486 = vst.msk [vmem:[%s2669_s6] sm:$0xff] %vm1220_vm0, %v1485_v60 }

</bundles_post_ra>
